<compile_context>
chip_gen: v7x
topology: tpu7x:2x2x1
jax: 0.10.0
libtpu: 0.0.40
codegen_flags: <defaults>
</compile_context>

<pallas_src>
import functools

import jax
import jax.numpy as jnp
from jax.experimental import pallas as pl
from jax.experimental.pallas import tpu as pltpu

_EPS = 1e-5


# ----------------------------------------------------------------------------
# Kernel
# ----------------------------------------------------------------------------
def _residual_net1_kernel(
    s_ref, t_ref,
    w1s_ref, w1t_ref, b1_ref,
    w2a_ref, b2a_ref, w2b_ref, b2b_ref, w2c_ref, b2c_ref,
    w3_ref, b3_ref,
    wf_ref, bf_ref,
    o_ref,
):
    f32 = jnp.float32
    et = t_ref[...].astype(f32)          # (TB, 1)
    et2 = et * et
    et3 = et2 * et                       # reuse t^2 for t^3 (review item)

    # mod1: folded Linear(S+3, 256)+BN.  Time-encoder concat folded into a
    # split matmul + three rank-1 broadcast updates (lane-dense, no concat).
    b = jnp.dot(s_ref[...].astype(f32), w1s_ref[...],
                preferred_element_type=f32)
    b = b + et * w1t_ref[0:1, :] + et2 * w1t_ref[1:2, :] + et3 * w1t_ref[2:3, :]
    b = b + b1_ref[...]

    # mod2 (ReLU -> L -> BN, x3) + residual
    h = jnp.maximum(b, 0.0)
    h = jnp.dot(h, w2a_ref[...], preferred_element_type=f32) + b2a_ref[...]
    h = jnp.maximum(h, 0.0)
    h = jnp.dot(h, w2b_ref[...], preferred_element_type=f32) + b2b_ref[...]
    h = jnp.maximum(h, 0.0)
    h = jnp.dot(h, w2c_ref[...], preferred_element_type=f32) + b2c_ref[...]
    c = h + b

    # mod3 + residual
    h = jnp.maximum(c, 0.0)
    h = jnp.dot(h, w3_ref[...], preferred_element_type=f32) + b3_ref[...]
    d = h + c

    # fin: ReLU -> Linear(256, S) with bias
    h = jnp.maximum(d, 0.0)
    e = jnp.dot(h, wf_ref[...], preferred_element_type=f32) + bf_ref[...]
    o_ref[...] = e.astype(o_ref.dtype)


# ----------------------------------------------------------------------------
# Wrapper
# ----------------------------------------------------------------------------
def _fold_linear_bn(W, bn_params):
    """Fold eval-mode BatchNorm1d into the preceding bias-free Linear."""
    gamma, beta, mean, var = bn_params
    scale = gamma / jnp.sqrt(var + _EPS)                 # (out,)
    W_eff = (W * scale[None, :]).astype(jnp.float32)     # (in, out)
    b_eff = (beta - mean * scale).reshape(1, -1).astype(jnp.float32)
    return W_eff, b_eff


def residual_net1_forward(s, t, z, params):
    """s: (B, S) float, t: (B,) or (B,1), z unused (Z=0). Returns (B, S) f32."""
    del z  # ResidualNet1 asserts Z == 0 (non-conditional)
    B, S = s.shape

    # Fold BN into linears (inference mode).
    W1, b1 = _fold_linear_bn(params["W1"], params["bn1"])
    w1s, w1t = W1[:S], W1[S:S + 3]                       # (S,256), (3,256)
    W2a, b2a = _fold_linear_bn(params["W2a"], params["bn2a"])
    W2b, b2b = _fold_linear_bn(params["W2b"], params["bn2b"])
    W2c, b2c = _fold_linear_bn(params["W2c"], params["bn2c"])
    W3, b3 = _fold_linear_bn(params["W3"], params["bn3"])
    Wf = params["Wf"].astype(jnp.float32)                # (256, S)
    bf = params["bf"].reshape(1, -1).astype(jnp.float32)  # (1, S)

    # Batch tile: multiple of 8 sublanes; large enough to amortize per-step
    # overhead, small enough to sit comfortably in v7x's 32 MiB scoped VMEM.
    TB = 256 if B >= 256 else ((B + 7) // 8) * 8
    B_pad = ((B + TB - 1) // TB) * TB
    s32 = s.astype(jnp.float32)
    t32 = t.reshape(-1).astype(jnp.float32)
    if B_pad != B:
        s32 = jnp.pad(s32, ((0, B_pad - B), (0, 0)))
        t32 = jnp.pad(t32, (0, B_pad - B))
    t2d = t32.reshape(B_pad, 1)

    grid = (B_pad // TB,)

    def row_spec(cols):
        return pl.BlockSpec((TB, cols), lambda i: (i, 0))

    def const_spec(arr):
        # Full-array block, constant index map -> stays resident in VMEM.
        return pl.BlockSpec(arr.shape, lambda i: (0, 0))

    out = pl.pallas_call(
        _residual_net1_kernel,
        out_shape=jax.ShapeDtypeStruct((B_pad, S), jnp.float32),
        grid=grid,
        in_specs=[
            row_spec(S),           # s tile
            row_spec(1),           # t tile
            const_spec(w1s), const_spec(w1t), const_spec(b1),
            const_spec(W2a), const_spec(b2a),
            const_spec(W2b), const_spec(b2b),
            const_spec(W2c), const_spec(b2c),
            const_spec(W3), const_spec(b3),
            const_spec(Wf), const_spec(bf),
        ],
        out_specs=row_spec(S),
        compiler_params=pltpu.CompilerParams(
            dimension_semantics=("parallel",)),
    )(s32, t2d, w1s, w1t, b1, W2a, b2a, W2b, b2b, W2c, b2c, W3, b3, Wf, bf)

    return out[:B]


# ----------------------------------------------------------------------------
# Pure-JAX reference (unfolded, eval-mode BN) and parameter init
# ----------------------------------------------------------------------------
def reference_forward(s, t, params):
    def bn(x, bn_params):
        g, bta, m, v = bn_params
        return (x - m) / jnp.sqrt(v + _EPS) * g + bta

    et = t.reshape(-1, 1).astype(jnp.float32)
    a = jnp.concatenate([s.astype(jnp.float32), et, et ** 2, et ** 3], axis=1)
    b = bn(a @ params["W1"], params["bn1"])
    h = jnp.maximum(b, 0.0)
    h = bn(h @ params["W2a"], params["bn2a"])
    h = jnp.maximum(h, 0.0)
    h = bn(h @ params["W2b"], params["bn2b"])
    h = jnp.maximum(h, 0.0)
    h = bn(h @ params["W2c"], params["bn2c"])
    c = h + b
    h = jnp.maximum(c, 0.0)
    h = bn(h @ params["W3"], params["bn3"])
    d = h + c
    h = jnp.maximum(d, 0.0)
    return h @ params["Wf"] + params["bf"]


def init_params(key, S):
    cin = S + 3

    def lin(k, fan_in, fan_out):
        bound = 1.0 / (fan_in ** 0.5)
        return jax.random.uniform(k, (fan_in, fan_out), jnp.float32,
                                  -bound, bound)

    def bn(k, n):
        k1, k2, k3, k4 = jax.random.split(k, 4)
        gamma = jax.random.uniform(k1, (n,), jnp.float32, 0.5, 1.5)
        beta = 0.1 * jax.random.normal(k2, (n,), jnp.float32)
        mean = 0.1 * jax.random.normal(k3, (n,), jnp.float32)
        var = jax.random.uniform(k4, (n,), jnp.float32, 0.5, 1.5)
        return (gamma, beta, mean, var)

    ks = jax.random.split(key, 12)
    p = {
        "W1": lin(ks[0], cin, 256), "bn1": bn(ks[1], 256),
        "W2a": lin(ks[2], 256, 512), "bn2a": bn(ks[3], 512),
        "W2b": lin(ks[4], 512, 512), "bn2b": bn(ks[5], 512),
        "W2c": lin(ks[6], 512, 256), "bn2c": bn(ks[7], 256),
        "W3": lin(ks[8], 256, 256), "bn3": bn(ks[9], 256),
        "Wf": lin(ks[10], 256, S),
        "bf": jax.random.uniform(ks[11], (S,), jnp.float32, -1 / 16.0, 1 / 16.0),
    }
    return p


if __name__ == "__main__":
    key = jax.random.PRNGKey(0)
    kp, ksd, ktd = jax.random.split(key, 3)
    B, S = 2, 8  # meta['S'] = 8, meta['Z'] = 0, timeEncoderKind='identSquareCube'

    params = init_params(kp, S)
    s = jax.random.normal(ksd, (B, S), dtype=jnp.float32)
    t = jax.random.uniform(ktd, (B,), dtype=jnp.float32)

    out = residual_net1_forward(s, t, None, params)
    out = jax.block_until_ready(out)

    ref = reference_forward(s, t, params)
    assert out.shape == (B, S), out.shape
    assert jnp.allclose(out, ref, atol=1e-2, rtol=1e-2), \
        f"mismatch vs reference, max abs diff {jnp.max(jnp.abs(out - ref))}"
    print("KERNEL_OK")
</pallas_src>

<mosaic_0001>
module attributes {stable_mosaic.version = 11 : i64} {
  func.func @_residual_net1_kernel(%arg0: i32, %arg1: memref<8x8xf32, #tpu.memory_space<vmem>>, %arg2: memref<8x1xf32, #tpu.memory_space<vmem>>, %arg3: memref<8x256xf32, #tpu.memory_space<vmem>>, %arg4: memref<3x256xf32, #tpu.memory_space<vmem>>, %arg5: memref<1x256xf32, #tpu.memory_space<vmem>>, %arg6: memref<256x512xf32, #tpu.memory_space<vmem>>, %arg7: memref<1x512xf32, #tpu.memory_space<vmem>>, %arg8: memref<512x512xf32, #tpu.memory_space<vmem>>, %arg9: memref<1x512xf32, #tpu.memory_space<vmem>>, %arg10: memref<512x256xf32, #tpu.memory_space<vmem>>, %arg11: memref<1x256xf32, #tpu.memory_space<vmem>>, %arg12: memref<256x256xf32, #tpu.memory_space<vmem>>, %arg13: memref<1x256xf32, #tpu.memory_space<vmem>>, %arg14: memref<256x8xf32, #tpu.memory_space<vmem>>, %arg15: memref<1x8xf32, #tpu.memory_space<vmem>>, %arg16: memref<8x8xf32, #tpu.memory_space<vmem>>) attributes {dimension_semantics = [#tpu.dimension_semantics<parallel>], iteration_bounds = array<i64: 1>, scalar_prefetch = 0 : i64, scratch_operands = 0 : i64, tpu.core_type = #tpu.core_type<tc>, window_params = [{transform_indices = @transform_0, window_bounds = array<i64: 8, 8>}, {transform_indices = @transform_1, window_bounds = array<i64: 8, 1>}, {pipeline_mode = #tpu.pipeline_mode<synchronous>, transform_indices = @transform_2, window_bounds = array<i64: 8, 256>}, {pipeline_mode = #tpu.pipeline_mode<synchronous>, transform_indices = @transform_3, window_bounds = array<i64: 3, 256>}, {pipeline_mode = #tpu.pipeline_mode<synchronous>, transform_indices = @transform_4, window_bounds = array<i64: 1, 256>}, {pipeline_mode = #tpu.pipeline_mode<synchronous>, transform_indices = @transform_5, window_bounds = array<i64: 256, 512>}, {pipeline_mode = #tpu.pipeline_mode<synchronous>, transform_indices = @transform_6, window_bounds = array<i64: 1, 512>}, {pipeline_mode = #tpu.pipeline_mode<synchronous>, transform_indices = @transform_7, window_bounds = array<i64: 512, 512>}, {pipeline_mode = #tpu.pipeline_mode<synchronous>, transform_indices = @transform_8, window_bounds = array<i64: 1, 512>}, {pipeline_mode = #tpu.pipeline_mode<synchronous>, transform_indices = @transform_9, window_bounds = array<i64: 512, 256>}, {pipeline_mode = #tpu.pipeline_mode<synchronous>, transform_indices = @transform_10, window_bounds = array<i64: 1, 256>}, {pipeline_mode = #tpu.pipeline_mode<synchronous>, transform_indices = @transform_11, window_bounds = array<i64: 256, 256>}, {pipeline_mode = #tpu.pipeline_mode<synchronous>, transform_indices = @transform_12, window_bounds = array<i64: 1, 256>}, {pipeline_mode = #tpu.pipeline_mode<synchronous>, transform_indices = @transform_13, window_bounds = array<i64: 256, 8>}, {pipeline_mode = #tpu.pipeline_mode<synchronous>, transform_indices = @transform_14, window_bounds = array<i64: 1, 8>}, {transform_indices = @transform_15, window_bounds = array<i64: 8, 8>}]} {
    %c0 = arith.constant 0 : index
    %c0_0 = arith.constant 0 : index
    %0 = vector.load %arg2[%c0, %c0_0] : memref<8x1xf32, #tpu.memory_space<vmem>>, vector<8x1xf32>
    %1 = arith.mulf %0, %0 : vector<8x1xf32>
    %2 = arith.mulf %1, %0 : vector<8x1xf32>
    %c0_1 = arith.constant 0 : index
    %c0_2 = arith.constant 0 : index
    %3 = vector.load %arg1[%c0_1, %c0_2] : memref<8x8xf32, #tpu.memory_space<vmem>>, vector<8x8xf32>
    %c0_3 = arith.constant 0 : index
    %c0_4 = arith.constant 0 : index
    %4 = vector.load %arg3[%c0_3, %c0_4] : memref<8x256xf32, #tpu.memory_space<vmem>>, vector<8x256xf32>
    %cst = arith.constant dense<0.000000e+00> : vector<8x256xf32>
    %5 = tpu.matmul %3, %4, %cst {dimension_numbers = #tpu.dot_dimension_numbers<[1], [0], [0], [1], [0, 0, 1, 1], [], []>} : vector<8x8xf32>, vector<8x256xf32>, vector<8x256xf32> -> vector<8x256xf32>
    %c0_5 = arith.constant 0 : index
    %c0_6 = arith.constant 0 : index
    %6 = vector.load %arg4[%c0_5, %c0_6] : memref<3x256xf32, #tpu.memory_space<vmem>>, vector<1x256xf32>
    %7 = vector.broadcast %0 : vector<8x1xf32> to vector<8x256xf32>
    %8 = vector.broadcast %6 : vector<1x256xf32> to vector<8x256xf32>
    %9 = arith.mulf %7, %8 : vector<8x256xf32>
    %10 = arith.addf %5, %9 : vector<8x256xf32>
    %c1 = arith.constant 1 : index
    %c0_7 = arith.constant 0 : index
    %11 = vector.load %arg4[%c1, %c0_7] : memref<3x256xf32, #tpu.memory_space<vmem>>, vector<1x256xf32>
    %12 = vector.broadcast %1 : vector<8x1xf32> to vector<8x256xf32>
    %13 = vector.broadcast %11 : vector<1x256xf32> to vector<8x256xf32>
    %14 = arith.mulf %12, %13 : vector<8x256xf32>
    %15 = arith.addf %10, %14 : vector<8x256xf32>
    %c2 = arith.constant 2 : index
    %c0_8 = arith.constant 0 : index
    %16 = vector.load %arg4[%c2, %c0_8] : memref<3x256xf32, #tpu.memory_space<vmem>>, vector<1x256xf32>
    %17 = vector.broadcast %2 : vector<8x1xf32> to vector<8x256xf32>
    %18 = vector.broadcast %16 : vector<1x256xf32> to vector<8x256xf32>
    %19 = arith.mulf %17, %18 : vector<8x256xf32>
    %20 = arith.addf %15, %19 : vector<8x256xf32>
    %c0_9 = arith.constant 0 : index
    %c0_10 = arith.constant 0 : index
    %21 = vector.load %arg5[%c0_9, %c0_10] : memref<1x256xf32, #tpu.memory_space<vmem>>, vector<1x256xf32>
    %22 = vector.broadcast %21 : vector<1x256xf32> to vector<8x256xf32>
    %23 = arith.addf %20, %22 : vector<8x256xf32>
    %cst_11 = arith.constant 0.000000e+00 : f32
    %24 = vector.broadcast %cst_11 : f32 to vector<8x256xf32>
    %25 = arith.maximumf %23, %24 : vector<8x256xf32>
    %c0_12 = arith.constant 0 : index
    %c0_13 = arith.constant 0 : index
    %26 = vector.load %arg6[%c0_12, %c0_13] : memref<256x512xf32, #tpu.memory_space<vmem>>, vector<256x512xf32>
    %cst_14 = arith.constant dense<0.000000e+00> : vector<8x512xf32>
    %27 = tpu.matmul %25, %26, %cst_14 {dimension_numbers = #tpu.dot_dimension_numbers<[1], [0], [0], [1], [0, 0, 1, 1], [], []>} : vector<8x256xf32>, vector<256x512xf32>, vector<8x512xf32> -> vector<8x512xf32>
    %c0_15 = arith.constant 0 : index
    %c0_16 = arith.constant 0 : index
    %28 = vector.load %arg7[%c0_15, %c0_16] : memref<1x512xf32, #tpu.memory_space<vmem>>, vector<1x512xf32>
    %29 = vector.broadcast %28 : vector<1x512xf32> to vector<8x512xf32>
    %30 = arith.addf %27, %29 : vector<8x512xf32>
    %cst_17 = arith.constant 0.000000e+00 : f32
    %31 = vector.broadcast %cst_17 : f32 to vector<8x512xf32>
    %32 = arith.maximumf %30, %31 : vector<8x512xf32>
    %c0_18 = arith.constant 0 : index
    %c0_19 = arith.constant 0 : index
    %33 = vector.load %arg8[%c0_18, %c0_19] : memref<512x512xf32, #tpu.memory_space<vmem>>, vector<512x512xf32>
    %cst_20 = arith.constant dense<0.000000e+00> : vector<8x512xf32>
    %34 = tpu.matmul %32, %33, %cst_20 {dimension_numbers = #tpu.dot_dimension_numbers<[1], [0], [0], [1], [0, 0, 1, 1], [], []>} : vector<8x512xf32>, vector<512x512xf32>, vector<8x512xf32> -> vector<8x512xf32>
    %c0_21 = arith.constant 0 : index
    %c0_22 = arith.constant 0 : index
    %35 = vector.load %arg9[%c0_21, %c0_22] : memref<1x512xf32, #tpu.memory_space<vmem>>, vector<1x512xf32>
    %36 = vector.broadcast %35 : vector<1x512xf32> to vector<8x512xf32>
    %37 = arith.addf %34, %36 : vector<8x512xf32>
    %cst_23 = arith.constant 0.000000e+00 : f32
    %38 = vector.broadcast %cst_23 : f32 to vector<8x512xf32>
    %39 = arith.maximumf %37, %38 : vector<8x512xf32>
    %c0_24 = arith.constant 0 : index
    %c0_25 = arith.constant 0 : index
    %40 = vector.load %arg10[%c0_24, %c0_25] : memref<512x256xf32, #tpu.memory_space<vmem>>, vector<512x256xf32>
    %cst_26 = arith.constant dense<0.000000e+00> : vector<8x256xf32>
    %41 = tpu.matmul %39, %40, %cst_26 {dimension_numbers = #tpu.dot_dimension_numbers<[1], [0], [0], [1], [0, 0, 1, 1], [], []>} : vector<8x512xf32>, vector<512x256xf32>, vector<8x256xf32> -> vector<8x256xf32>
    %c0_27 = arith.constant 0 : index
    %c0_28 = arith.constant 0 : index
    %42 = vector.load %arg11[%c0_27, %c0_28] : memref<1x256xf32, #tpu.memory_space<vmem>>, vector<1x256xf32>
    %43 = vector.broadcast %42 : vector<1x256xf32> to vector<8x256xf32>
    %44 = arith.addf %41, %43 : vector<8x256xf32>
    %45 = arith.addf %44, %23 : vector<8x256xf32>
    %cst_29 = arith.constant 0.000000e+00 : f32
    %46 = vector.broadcast %cst_29 : f32 to vector<8x256xf32>
    %47 = arith.maximumf %45, %46 : vector<8x256xf32>
    %c0_30 = arith.constant 0 : index
    %c0_31 = arith.constant 0 : index
    %48 = vector.load %arg12[%c0_30, %c0_31] : memref<256x256xf32, #tpu.memory_space<vmem>>, vector<256x256xf32>
    %cst_32 = arith.constant dense<0.000000e+00> : vector<8x256xf32>
    %49 = tpu.matmul %47, %48, %cst_32 {dimension_numbers = #tpu.dot_dimension_numbers<[1], [0], [0], [1], [0, 0, 1, 1], [], []>} : vector<8x256xf32>, vector<256x256xf32>, vector<8x256xf32> -> vector<8x256xf32>
    %c0_33 = arith.constant 0 : index
    %c0_34 = arith.constant 0 : index
    %50 = vector.load %arg13[%c0_33, %c0_34] : memref<1x256xf32, #tpu.memory_space<vmem>>, vector<1x256xf32>
    %51 = vector.broadcast %50 : vector<1x256xf32> to vector<8x256xf32>
    %52 = arith.addf %49, %51 : vector<8x256xf32>
    %53 = arith.addf %52, %45 : vector<8x256xf32>
    %cst_35 = arith.constant 0.000000e+00 : f32
    %54 = vector.broadcast %cst_35 : f32 to vector<8x256xf32>
    %55 = arith.maximumf %53, %54 : vector<8x256xf32>
    %c0_36 = arith.constant 0 : index
    %c0_37 = arith.constant 0 : index
    %56 = vector.load %arg14[%c0_36, %c0_37] : memref<256x8xf32, #tpu.memory_space<vmem>>, vector<256x8xf32>
    %cst_38 = arith.constant dense<0.000000e+00> : vector<8x8xf32>
    %57 = tpu.matmul %55, %56, %cst_38 {dimension_numbers = #tpu.dot_dimension_numbers<[1], [0], [0], [1], [0, 0, 1, 1], [], []>} : vector<8x256xf32>, vector<256x8xf32>, vector<8x8xf32> -> vector<8x8xf32>
    %c0_39 = arith.constant 0 : index
    %c0_40 = arith.constant 0 : index
    %58 = vector.load %arg15[%c0_39, %c0_40] : memref<1x8xf32, #tpu.memory_space<vmem>>, vector<1x8xf32>
    %59 = vector.broadcast %58 : vector<1x8xf32> to vector<8x8xf32>
    %60 = arith.addf %57, %59 : vector<8x8xf32>
    %c0_41 = arith.constant 0 : index
    %c0_42 = arith.constant 0 : index
    %61 = vector.load %arg16[%c0_41, %c0_42] : memref<8x8xf32, #tpu.memory_space<vmem>>, vector<8x8xf32>
    tpu.vector_store %arg16[%c0_41, %c0_42], %60 {strides = array<i32>} : memref<8x8xf32, #tpu.memory_space<vmem>>, vector<8x8xf32>,
    return
  }
  func.func @transform_0(%arg0: i32) -> (i32, i32) {
    %c0_i32 = arith.constant 0 : i32
    %c0_i32_0 = arith.constant 0 : i32
    return %arg0, %c0_i32 : i32, i32
  }
  func.func @transform_1(%arg0: i32) -> (i32, i32) {
    %c0_i32 = arith.constant 0 : i32
    %c0_i32_0 = arith.constant 0 : i32
    return %arg0, %c0_i32 : i32, i32
  }
  func.func @transform_2(%arg0: i32) -> (i32, i32) {
    %c0_i32 = arith.constant 0 : i32
    %c0_i32_0 = arith.constant 0 : i32
    %c0_i32_1 = arith.constant 0 : i32
    return %c0_i32, %c0_i32_0 : i32, i32
  }
  func.func @transform_3(%arg0: i32) -> (i32, i32) {
    %c0_i32 = arith.constant 0 : i32
    %c0_i32_0 = arith.constant 0 : i32
    %c0_i32_1 = arith.constant 0 : i32
    return %c0_i32, %c0_i32_0 : i32, i32
  }
  func.func @transform_4(%arg0: i32) -> (i32, i32) {
    %c0_i32 = arith.constant 0 : i32
    %c0_i32_0 = arith.constant 0 : i32
    %c0_i32_1 = arith.constant 0 : i32
    return %c0_i32, %c0_i32_0 : i32, i32
  }
  func.func @transform_5(%arg0: i32) -> (i32, i32) {
    %c0_i32 = arith.constant 0 : i32
    %c0_i32_0 = arith.constant 0 : i32
    %c0_i32_1 = arith.constant 0 : i32
    return %c0_i32, %c0_i32_0 : i32, i32
  }
  func.func @transform_6(%arg0: i32) -> (i32, i32) {
    %c0_i32 = arith.constant 0 : i32
    %c0_i32_0 = arith.constant 0 : i32
    %c0_i32_1 = arith.constant 0 : i32
    return %c0_i32, %c0_i32_0 : i32, i32
  }
  func.func @transform_7(%arg0: i32) -> (i32, i32) {
    %c0_i32 = arith.constant 0 : i32
    %c0_i32_0 = arith.constant 0 : i32
    %c0_i32_1 = arith.constant 0 : i32
    return %c0_i32, %c0_i32_0 : i32, i32
  }
  func.func @transform_8(%arg0: i32) -> (i32, i32) {
    %c0_i32 = arith.constant 0 : i32
    %c0_i32_0 = arith.constant 0 : i32
    %c0_i32_1 = arith.constant 0 : i32
    return %c0_i32, %c0_i32_0 : i32, i32
  }
  func.func @transform_9(%arg0: i32) -> (i32, i32) {
    %c0_i32 = arith.constant 0 : i32
    %c0_i32_0 = arith.constant 0 : i32
    %c0_i32_1 = arith.constant 0 : i32
    return %c0_i32, %c0_i32_0 : i32, i32
  }
  func.func @transform_10(%arg0: i32) -> (i32, i32) {
    %c0_i32 = arith.constant 0 : i32
    %c0_i32_0 = arith.constant 0 : i32
    %c0_i32_1 = arith.constant 0 : i32
    return %c0_i32, %c0_i32_0 : i32, i32
  }
  func.func @transform_11(%arg0: i32) -> (i32, i32) {
    %c0_i32 = arith.constant 0 : i32
    %c0_i32_0 = arith.constant 0 : i32
    %c0_i32_1 = arith.constant 0 : i32
    return %c0_i32, %c0_i32_0 : i32, i32
  }
  func.func @transform_12(%arg0: i32) -> (i32, i32) {
    %c0_i32 = arith.constant 0 : i32
    %c0_i32_0 = arith.constant 0 : i32
    %c0_i32_1 = arith.constant 0 : i32
    return %c0_i32, %c0_i32_0 : i32, i32
  }
  func.func @transform_13(%arg0: i32) -> (i32, i32) {
    %c0_i32 = arith.constant 0 : i32
    %c0_i32_0 = arith.constant 0 : i32
    %c0_i32_1 = arith.constant 0 : i32
    return %c0_i32, %c0_i32_0 : i32, i32
  }
  func.func @transform_14(%arg0: i32) -> (i32, i32) {
    %c0_i32 = arith.constant 0 : i32
    %c0_i32_0 = arith.constant 0 : i32
    %c0_i32_1 = arith.constant 0 : i32
    return %c0_i32, %c0_i32_0 : i32, i32
  }
  func.func @transform_15(%arg0: i32) -> (i32, i32) {
    %c0_i32 = arith.constant 0 : i32
    %c0_i32_0 = arith.constant 0 : i32
    return %arg0, %c0_i32 : i32, i32
  }
}

</mosaic_0001>

<bundles_post_ra>
// kernel: tpu_custom_call.1
= control target key start
LH: loop header
LB: loop body
LE: loop exit
PB: predicated region body
PF: predicated region fallthrough
CT: control target
= control target key end

     0   :  { %20 = vsyncpa [#allocation3], 0  ;;  %s2845_s0 = inlined_call_operand.vmem [shape: f32[8,8], index: 0, kind: input, shape index: {}]   ;;  %s2846_s1 = inlined_call_operand.vmem [shape: f32[8,1], index: 1, kind: input, shape index: {}]   ;;  %s2847_s2 = inlined_call_operand.vmem [shape: f32[8,256], index: 2, kind: input, shape index: {}]   ;;  %s2848_s3 = inlined_call_operand.vmem [shape: f32[3,256], index: 3, kind: input, shape index: {}]   ;;  %s2849_s4 = inlined_call_operand.vmem [shape: f32[1,256], index: 4, kind: input, shape index: {}]   ;;  %s2850_s5 = inlined_call_operand.hbm [shape: f32[256,512], index: 5, kind: input, shape index: {}]   ;;  %s2851_s6 = inlined_call_operand.vmem [shape: f32[1,512], index: 6, kind: input, shape index: {}]   ;;  %s2852_s7 = inlined_call_operand.hbm [shape: f32[512,512], index: 7, kind: input, shape index: {}]   ;;  %s2853_s8 = inlined_call_operand.vmem [shape: f32[1,512], index: 8, kind: input, shape index: {}]   ;;  %s2854_s9 = inlined_call_operand.hbm [shape: f32[512,256], index: 9, kind: input, shape index: {}]   ;;  %s2855_s10 = inlined_call_operand.vmem [shape: f32[1,256], index: 10, kind: input, shape index: {}]   ;;  %s2856_s11 = inlined_call_operand.hbm [shape: f32[256,256], index: 11, kind: input, shape index: {}]   ;;  %s2857_s12 = inlined_call_operand.vmem [shape: f32[1,256], index: 12, kind: input, shape index: {}]   ;;  %s2858_s13 = inlined_call_operand.vmem [shape: f32[256,8], index: 13, kind: input, shape index: {}]   ;;  %s2859_s14 = inlined_call_operand.vmem [shape: f32[1,8], index: 14, kind: input, shape index: {}]   ;;  %s2860_s15 = inlined_call_operand.hbm [shape: f32[8,8], index: 15, kind: output, shape index: {}]  }
   0x1   :  { %21 = vsyncpa [#allocation6], 0 }
   0x2   :  { %22 = vsyncpa [#allocation9], 0 }
   0x3   :  { %23 = vsyncpa [#allocation4], 0  ;;  %s2482_s18 = smov [#allocation5]   ;;  %s2483_s20 = smov [#allocation2]  }
   0x4   :  { %s53_s19 = sshll.u32 %s2482_s18, 4  ;;  %s39_s21 = sshll.u32 %s2483_s20, 4  ;;  %s54_s19 = int_to_ptr.vmem [resolvable:$true] %s53_s19  ;;  %s2573_s21 = int_to_ptr.vmem [resolvable:$true] %s39_s21 }
   0x5   :  { %s2364_s24 = scalar_lea.hbm %s2852_s7, 32768 }
   0x6   :  { %p2365_p0 = scmp.ne.s32.totalorder %s2852_s7, %s2364_s24  ;;  %p2368_p1 = scmp.lt.u32.totalorder %s2364_s24, %s2852_s7 }
   0x8   :  { %p2370_p2 = pnand %p2368_p1, %p2365_p0 }
   0xa   :  { %2373 = shalt.err (!%p2370_p2)
}
   0xb   :  { %s2374_s29 = scalar_lea.vmem %s54_s19, 32768  ;;  %p2379_p4 = scmp.lt.s32.totalorder %s54_s19, %s54_s19 }
   0xc   :  { %p2375_p3 = scmp.ne.s32.totalorder %s54_s19, %s2374_s29  ;;  %p2380_p5 = scmp.lt.s32.totalorder %s2374_s29, %s2374_s29 }
   0xe   :  { %p2381_p6 = por %p2380_p5, %p2379_p4 }
  0x10   :  { %p2382_p7 = pnand %p2381_p6, %p2375_p3 }
  0x12   :  { %2385 = shalt.err (!%p2382_p7)
}
  0x13   :  { %s2484_s30 = smov 512   ;;  %s2485_s16 = smov 32  }
  0x14   :  { %59 = dma.hbm_to_vmem [thread:$0]  %s2852_s7, 32768, %s54_s19, [#allocation6], %s2484_s30, %s2484_s30, %s2485_s16  }
  0x15   :  { %s2386_s23 = scalar_lea.hbm %s2850_s5, 16384 }
  0x16   :  { %p2387_p8 = scmp.ne.s32.totalorder %s2850_s5, %s2386_s23  ;;  %p2390_p9 = scmp.lt.u32.totalorder %s2386_s23, %s2850_s5 }
  0x18   :  { %p2392_p10 = pnand %p2390_p9, %p2387_p8 }
  0x1a   :  { %2395 = shalt.err (!%p2392_p10)
}
  0x1b   :  { %s2396_s28 = scalar_lea.vmem %s2573_s21, 16384  ;;  %p2401_p12 = scmp.lt.s32.totalorder %s2573_s21, %s2573_s21 }
  0x1c   :  { %p2397_p11 = scmp.ne.s32.totalorder %s2573_s21, %s2396_s28  ;;  %p2402_p13 = scmp.lt.s32.totalorder %s2396_s28, %s2396_s28 }
  0x1e   :  { %p2403_p0 = por %p2402_p13, %p2401_p12 }
  0x20   :  { %p2404_p1 = pnand %p2403_p0, %p2397_p11 }
  0x22   :  { %2407 = shalt.err (!%p2404_p1)
}
  0x23   :  { %45 = dma.hbm_to_vmem [thread:$0]  %s2850_s5, 16384, %s2573_s21, [#allocation3], %s2484_s30, %s2484_s30, %s2485_s16  }
  0x24   :  { %s2486_s29 = smov [#allocation7]   ;;  %s2408_s22 = scalar_lea.hbm %s2854_s9, 16384 }
  0x25   :  { %s67_s17 = sshll.u32 %s2486_s29, 4  ;;  %p2409_p2 = scmp.ne.s32.totalorder %s2854_s9, %s2408_s22  ;;  %s68_s17 = int_to_ptr.vmem [resolvable:$true] %s67_s17 }
  0x26   :  { %p2412_p3 = scmp.lt.u32.totalorder %s2408_s22, %s2854_s9 }
  0x28   :  { %p2414_p4 = pnand %p2412_p3, %p2409_p2 }
  0x2a   :  { %2417 = shalt.err (!%p2414_p4)
}
  0x2b   :  { %s2418_s27 = scalar_lea.vmem %s68_s17, 16384  ;;  %p2423_p6 = scmp.lt.s32.totalorder %s68_s17, %s68_s17 }
  0x2c   :  { %p2419_p5 = scmp.ne.s32.totalorder %s68_s17, %s2418_s27  ;;  %p2424_p7 = scmp.lt.s32.totalorder %s2418_s27, %s2418_s27 }
  0x2e   :  { %p2425_p8 = por %p2424_p7, %p2423_p6 }
  0x30   :  { %p2426_p9 = pnand %p2425_p8, %p2419_p5 }
  0x32   :  { %2429 = shalt.err (!%p2426_p9)
}
  0x33   :  { %s2487_s5 = smov 256   ;;  %s2488_s21 = smov 16  }
  0x34   :  { %73 = dma.hbm_to_vmem [thread:$0]  %s2854_s9, 16384, %s68_s17, [#allocation6], %s2487_s5, %s2487_s5, %s2488_s21  }
  0x35   :  { %s2489_s28 = smov [#allocation8]   ;;  %s2430_s18 = scalar_lea.hbm %s2856_s11, 8192 }
  0x36   :  { %s81_s7 = sshll.u32 %s2489_s28, 4  ;;  %p2431_p10 = scmp.ne.s32.totalorder %s2856_s11, %s2430_s18  ;;  %s82_s7 = int_to_ptr.vmem [resolvable:$true] %s81_s7 }
  0x37   :  { %p2434_p11 = scmp.lt.u32.totalorder %s2430_s18, %s2856_s11 }
  0x39   :  { %p2436_p12 = pnand %p2434_p11, %p2431_p10 }
  0x3b   :  { %2439 = shalt.err (!%p2436_p12)
}
  0x3c   :  { %s2440_s25 = scalar_lea.vmem %s82_s7, 8192  ;;  %p2445_p0 = scmp.lt.s32.totalorder %s82_s7, %s82_s7 }
  0x3d   :  { %p2441_p13 = scmp.ne.s32.totalorder %s82_s7, %s2440_s25  ;;  %p2446_p1 = scmp.lt.s32.totalorder %s2440_s25, %s2440_s25 }
  0x3f   :  { %p2447_p2 = por %p2446_p1, %p2445_p0 }
  0x41   :  { %p2448_p3 = pnand %p2447_p2, %p2441_p13 }
  0x43   :  { %2451 = shalt.err (!%p2448_p3)
}
  0x44   :  { %87 = dma.hbm_to_vmem [thread:$0]  %s2856_s11, 8192, %s82_s7, [#allocation9], %s2487_s5, %s2487_s5, %s2488_s21  }
  0x45   :  { %2474 = dma.done.wait [#allocation3], 16384  }
  0x46   :  { %2475 = vsyncadd [#allocation3], 4294950912 }
  0x47   :  { %2476 = dma.done.wait [#allocation6], 49152  }
  0x48   :  { %2477 = vsyncadd [#allocation6], 4294918144 }
  0x49   :  { %2478 = dma.done.wait [#allocation9], 8192  }
  0x4a   :  { %2479 = vsyncadd [#allocation9], 4294959104  ;;  %v2490_v0 = vmov 0.0   ;;  %v2491_v1 = vmov 0   ;;  %v111_v2 = vld [vmem:[%s2847_s2 + $0x8] sm:$0xff]  ;;  %v110_v3 = vld [vmem:[%s2847_s2] sm:$0xff] }
  0x4b   :  { %199 = vmatprep.mubr.f32.mxu0 %v2490_v0  ;;  %2362 = vset.pattern.permute.xlu0 %v2491_v1  ;;  %v109_v4 = vld [vmem:[%s2845_s0] sm:$0xff]  ;;  %vm131_vm0 = vcmask 64512   ;;  %v267_v6 = vld [vmem:[#allocation2 + $0x8] sm:$0xff]  ;;  %v269_v10 = vld [vmem:[#allocation2 + $0x18] sm:$0xff] }
  0x4c   :  { %2363 = vset.pattern.permute.xlu1 %v2491_v1  ;;  %135 = vmatprep.subr.mxu0 %v111_v2  ;;  %v106_v5 = vld [vmem:[%s2846_s1] sm:$0xff]  ;;  %v271_v7 = vld [vmem:[#allocation2 + $0x28] sm:$0xff]  ;;  %v273_v11 = vld [vmem:[#allocation2 + $0x38] sm:$0xff] }
  0x4d   :  { %136 = vmatpush1.msra.mxu0 %v110_v3  ;;  %115 = vperm.xlu0 %2362, %v106_v5   ;;  %v107_v8 = vmul.f32 %v106_v5, %v106_v5  ;;  %v1731_v9 = vpack.c.bf16 %v271_v7, %v267_v6  ;;  %v266_v12 = vld [vmem:[#allocation2] sm:$0xff]  ;;  %v1795_v13 = vpack.c.bf16 %v273_v11, %v269_v10  ;;  %v268_v15 = vld [vmem:[#allocation2 + $0x10] sm:$0xff]  ;;  %v275_v20 = vld [vmem:[#allocation2 + $0x48] sm:$0xff] }
  0x4e   :  { %1692 = vmatmul.mubr.msk.f32.vlgmr.msra.gmra.mrb[0].mxu0 %vm131_vm0, %v109_v4  ;;  %v270_v14 = vld [vmem:[#allocation2 + $0x20] sm:$0xff]  ;;  %v272_v16 = vld [vmem:[#allocation2 + $0x30] sm:$0xff]  ;;  %v279_v21 = vld [vmem:[#allocation2 + $0x68] sm:$0xff] }
  0x4f   :  { %v108_v17 = vmul.f32 %v107_v8, %v106_v5  ;;  %1732 = vmatprep.subr.bf16.mxu1 %v1731_v9  ;;  %v1733_v18 = vpack.c.bf16 %v270_v14, %v266_v12  ;;  %v1797_v19 = vpack.c.bf16 %v272_v16, %v268_v15  ;;  %v277_v22 = vld [vmem:[#allocation2 + $0x58] sm:$0xff]  ;;  %1796 = vmatprep.subr.bf16.mxu0 %v1795_v13  ;;  %v274_v25 = vld [vmem:[#allocation2 + $0x40] sm:$0xff]  ;;  %v276_v28 = vld [vmem:[#allocation2 + $0x50] sm:$0xff] }
  0x50   :  { %v1735_v23 = vpack.c.bf16 %v279_v21, %v275_v20  ;;  %v281_v24 = vld [vmem:[#allocation2 + $0x78] sm:$0xff]  ;;  %v278_v26 = vld [vmem:[#allocation2 + $0x60] sm:$0xff]  ;;  %v280_v29 = vld [vmem:[#allocation2 + $0x70] sm:$0xff] }
  0x51   :  { %210 = vperm.xlu0 %2362, %v107_v8   ;;  %232 = vperm.xlu1 %2363, %v108_v17   ;;  %v1799_v27 = vpack.c.bf16 %v281_v24, %v277_v22  ;;  %v283_v30 = vld [vmem:[#allocation2 + $0x88] sm:$0xff]  ;;  %v1737_v31 = vpack.c.bf16 %v278_v26, %v274_v25  ;;  %v1801_v32 = vpack.c.bf16 %v280_v29, %v276_v28  ;;  %v285_v34 = vld [vmem:[#allocation2 + $0x98] sm:$0xff]  ;;  %v282_v38 = vld [vmem:[#allocation2 + $0x80] sm:$0xff] }
  0x52   :  { %1734 = vmatpush1.bf16.msra.mxu1 %v1733_v18  ;;  %1798 = vmatpush1.bf16.msra.mxu0 %v1797_v19  ;;  %v287_v33 = vld [vmem:[#allocation2 + $0xa8] sm:$0xff]  ;;  %v289_v35 = vld [vmem:[#allocation2 + $0xb8] sm:$0xff]  ;;  %v286_v39 = vld [vmem:[#allocation2 + $0xa0] sm:$0xff] }
  0x53   :  { %1736 = vmatprep.subr.bf16.mxu1 %v1735_v23  ;;  %1800 = vmatprep.subr.bf16.mxu0 %v1799_v27  ;;  %v1739_v36 = vpack.c.bf16 %v287_v33, %v283_v30  ;;  %v1803_v37 = vpack.c.bf16 %v289_v35, %v285_v34  ;;  %v284_v40 = vld [vmem:[#allocation2 + $0x90] sm:$0xff]  ;;  %v291_v42 = vld [vmem:[#allocation2 + $0xc8] sm:$0xff]  ;;  %v293_v44 = vld [vmem:[#allocation2 + $0xd8] sm:$0xff]  ;;  %v1741_v46 = vpack.c.bf16 %v286_v39, %v282_v38 }
  0x54   :  { %v288_v41 = vld [vmem:[#allocation2 + $0xb0] sm:$0xff]  ;;  %v295_v43 = vld [vmem:[#allocation2 + $0xe8] sm:$0xff]  ;;  %v297_v45 = vld [vmem:[#allocation2 + $0xf8] sm:$0xff] }
  0x55   :  { %v1805_v47 = vpack.c.bf16 %v288_v41, %v284_v40  ;;  %v290_v48 = vld [vmem:[#allocation2 + $0xc0] sm:$0xff]  ;;  %v1743_v50 = vpack.c.bf16 %v295_v43, %v291_v42  ;;  %v1807_v51 = vpack.c.bf16 %v297_v45, %v293_v44  ;;  %v292_v52 = vld [vmem:[#allocation2 + $0xd0] sm:$0xff]  ;;  %v299_v54 = vld [vmem:[#allocation2 + $0x108] sm:$0xff] }
  0x56   :  { %1738 = vmatpush1.bf16.msra.mxu1 %v1737_v31  ;;  %1802 = vmatpush1.bf16.msra.mxu0 %v1801_v32  ;;  %v294_v49 = vld [vmem:[#allocation2 + $0xe0] sm:$0xff]  ;;  %v296_v53 = vld [vmem:[#allocation2 + $0xf0] sm:$0xff]  ;;  %v303_v55 = vld [vmem:[#allocation2 + $0x128] sm:$0xff] }
  0x57   :  { %1740 = vmatprep.subr.bf16.mxu1 %v1739_v36  ;;  %1804 = vmatprep.subr.bf16.mxu0 %v1803_v37  ;;  %v301_v56 = vld [vmem:[#allocation2 + $0x118] sm:$0xff]  ;;  %v1745_v58 = vpack.c.bf16 %v294_v49, %v290_v48  ;;  %v1809_v59 = vpack.c.bf16 %v296_v53, %v292_v52  ;;  %v298_v60 = vld [vmem:[#allocation2 + $0x100] sm:$0xff]  ;;  %v1747_v62 = vpack.c.bf16 %v303_v55, %v299_v54  ;;  %v300_v0 = vld [vmem:[#allocation2 + $0x110] sm:$0xff] }
  0x58   :  { %v305_v57 = vld [vmem:[#allocation2 + $0x138] sm:$0xff]  ;;  %v302_v61 = vld [vmem:[#allocation2 + $0x120] sm:$0xff]  ;;  %v304_v1 = vld [vmem:[#allocation2 + $0x130] sm:$0xff] }
  0x59   :  { %v1811_v63 = vpack.c.bf16 %v305_v57, %v301_v56  ;;  %v307_v2 = vld [vmem:[#allocation2 + $0x148] sm:$0xff]  ;;  %v309_v4 = vld [vmem:[#allocation2 + $0x158] sm:$0xff]  ;;  %v1749_v6 = vpack.c.bf16 %v302_v61, %v298_v60  ;;  %v1813_v7 = vpack.c.bf16 %v304_v1, %v300_v0  ;;  %v306_v8 = vld [vmem:[#allocation2 + $0x140] sm:$0xff] }
  0x5a   :  { %1742 = vmatpush1.bf16.msra.mxu1 %v1741_v46  ;;  %1806 = vmatpush1.bf16.msra.mxu0 %v1805_v47  ;;  %v311_v3 = vld [vmem:[#allocation2 + $0x168] sm:$0xff]  ;;  %v313_v5 = vld [vmem:[#allocation2 + $0x178] sm:$0xff]  ;;  %v310_v9 = vld [vmem:[#allocation2 + $0x160] sm:$0xff] }
  0x5b   :  { %1744 = vmatprep.subr.bf16.mxu1 %v1743_v50  ;;  %1808 = vmatprep.subr.bf16.mxu0 %v1807_v51  ;;  %v1751_v10 = vpack.c.bf16 %v311_v3, %v307_v2  ;;  %v1815_v11 = vpack.c.bf16 %v313_v5, %v309_v4  ;;  %v308_v12 = vld [vmem:[#allocation2 + $0x150] sm:$0xff]  ;;  %v315_v14 = vld [vmem:[#allocation2 + $0x188] sm:$0xff]  ;;  %v317_v16 = vld [vmem:[#allocation2 + $0x198] sm:$0xff]  ;;  %v1753_v18 = vpack.c.bf16 %v310_v9, %v306_v8 }
  0x5c   :  { %v312_v13 = vld [vmem:[#allocation2 + $0x170] sm:$0xff]  ;;  %v319_v15 = vld [vmem:[#allocation2 + $0x1a8] sm:$0xff]  ;;  %v321_v17 = vld [vmem:[#allocation2 + $0x1b8] sm:$0xff] }
  0x5d   :  { %v1817_v19 = vpack.c.bf16 %v312_v13, %v308_v12  ;;  %v314_v20 = vld [vmem:[#allocation2 + $0x180] sm:$0xff]  ;;  %v1755_v22 = vpack.c.bf16 %v319_v15, %v315_v14  ;;  %v1819_v23 = vpack.c.bf16 %v321_v17, %v317_v16  ;;  %v316_v24 = vld [vmem:[#allocation2 + $0x190] sm:$0xff]  ;;  %v323_v26 = vld [vmem:[#allocation2 + $0x1c8] sm:$0xff] }
  0x5e   :  { %1746 = vmatpush1.bf16.msra.mxu1 %v1745_v58  ;;  %1810 = vmatpush1.bf16.msra.mxu0 %v1809_v59  ;;  %v318_v21 = vld [vmem:[#allocation2 + $0x1a0] sm:$0xff]  ;;  %v320_v25 = vld [vmem:[#allocation2 + $0x1b0] sm:$0xff]  ;;  %v327_v27 = vld [vmem:[#allocation2 + $0x1e8] sm:$0xff] }
  0x5f   :  { %1748 = vmatprep.subr.bf16.mxu1 %v1747_v62  ;;  %1812 = vmatprep.subr.bf16.mxu0 %v1811_v63  ;;  %v325_v28 = vld [vmem:[#allocation2 + $0x1d8] sm:$0xff]  ;;  %v1757_v30 = vpack.c.bf16 %v318_v21, %v314_v20  ;;  %v1821_v31 = vpack.c.bf16 %v320_v25, %v316_v24  ;;  %v322_v32 = vld [vmem:[#allocation2 + $0x1c0] sm:$0xff]  ;;  %v1759_v34 = vpack.c.bf16 %v327_v27, %v323_v26  ;;  %v324_v36 = vld [vmem:[#allocation2 + $0x1d0] sm:$0xff] }
  0x60   :  { %v329_v29 = vld [vmem:[#allocation2 + $0x1f8] sm:$0xff]  ;;  %v326_v33 = vld [vmem:[#allocation2 + $0x1e0] sm:$0xff]  ;;  %v328_v37 = vld [vmem:[#allocation2 + $0x1f0] sm:$0xff] }
  0x61   :  { %v1823_v35 = vpack.c.bf16 %v329_v29, %v325_v28  ;;  %v331_v38 = vld [vmem:[#allocation2 + $0x208] sm:$0xff]  ;;  %v333_v40 = vld [vmem:[#allocation2 + $0x218] sm:$0xff]  ;;  %v1761_v42 = vpack.c.bf16 %v326_v33, %v322_v32  ;;  %v1825_v43 = vpack.c.bf16 %v328_v37, %v324_v36  ;;  %v330_v44 = vld [vmem:[#allocation2 + $0x200] sm:$0xff] }
  0x62   :  { %1750 = vmatpush1.bf16.msra.mxu1 %v1749_v6  ;;  %1814 = vmatpush1.bf16.msra.mxu0 %v1813_v7  ;;  %v335_v39 = vld [vmem:[#allocation2 + $0x228] sm:$0xff]  ;;  %v337_v41 = vld [vmem:[#allocation2 + $0x238] sm:$0xff]  ;;  %v334_v45 = vld [vmem:[#allocation2 + $0x220] sm:$0xff] }
  0x63   :  { %1752 = vmatprep.subr.bf16.mxu1 %v1751_v10  ;;  %1816 = vmatprep.subr.bf16.mxu0 %v1815_v11  ;;  %v1763_v46 = vpack.c.bf16 %v335_v39, %v331_v38  ;;  %v1827_v47 = vpack.c.bf16 %v337_v41, %v333_v40  ;;  %v332_v48 = vld [vmem:[#allocation2 + $0x210] sm:$0xff]  ;;  %v339_v50 = vld [vmem:[#allocation2 + $0x248] sm:$0xff]  ;;  %v341_v52 = vld [vmem:[#allocation2 + $0x258] sm:$0xff]  ;;  %v1765_v54 = vpack.c.bf16 %v334_v45, %v330_v44 }
  0x64   :  { %v336_v49 = vld [vmem:[#allocation2 + $0x230] sm:$0xff]  ;;  %v343_v51 = vld [vmem:[#allocation2 + $0x268] sm:$0xff]  ;;  %v345_v53 = vld [vmem:[#allocation2 + $0x278] sm:$0xff] }
  0x65   :  { %v1829_v55 = vpack.c.bf16 %v336_v49, %v332_v48  ;;  %v338_v56 = vld [vmem:[#allocation2 + $0x240] sm:$0xff]  ;;  %v1767_v58 = vpack.c.bf16 %v343_v51, %v339_v50  ;;  %v1831_v59 = vpack.c.bf16 %v345_v53, %v341_v52  ;;  %v340_v60 = vld [vmem:[#allocation2 + $0x250] sm:$0xff]  ;;  %v347_v62 = vld [vmem:[#allocation2 + $0x288] sm:$0xff] }
  0x66   :  { %1754 = vmatpush1.bf16.msra.mxu1 %v1753_v18  ;;  %1818 = vmatpush1.bf16.msra.mxu0 %v1817_v19  ;;  %v342_v57 = vld [vmem:[#allocation2 + $0x260] sm:$0xff]  ;;  %v344_v61 = vld [vmem:[#allocation2 + $0x270] sm:$0xff]  ;;  %v351_v63 = vld [vmem:[#allocation2 + $0x2a8] sm:$0xff] }
  0x67   :  { %1756 = vmatprep.subr.bf16.mxu1 %v1755_v22  ;;  %1820 = vmatprep.subr.bf16.mxu0 %v1819_v23  ;;  %v349_v0 = vld [vmem:[#allocation2 + $0x298] sm:$0xff]  ;;  %v1769_v2 = vpack.c.bf16 %v342_v57, %v338_v56  ;;  %v1833_v3 = vpack.c.bf16 %v344_v61, %v340_v60  ;;  %v346_v4 = vld [vmem:[#allocation2 + $0x280] sm:$0xff]  ;;  %v1771_v6 = vpack.c.bf16 %v351_v63, %v347_v62  ;;  %v348_v8 = vld [vmem:[#allocation2 + $0x290] sm:$0xff] }
  0x68   :  { %v353_v1 = vld [vmem:[#allocation2 + $0x2b8] sm:$0xff]  ;;  %v350_v5 = vld [vmem:[#allocation2 + $0x2a0] sm:$0xff]  ;;  %v352_v9 = vld [vmem:[#allocation2 + $0x2b0] sm:$0xff] }
  0x69   :  { %v1835_v7 = vpack.c.bf16 %v353_v1, %v349_v0  ;;  %v355_v10 = vld [vmem:[#allocation2 + $0x2c8] sm:$0xff]  ;;  %v357_v12 = vld [vmem:[#allocation2 + $0x2d8] sm:$0xff]  ;;  %v1773_v14 = vpack.c.bf16 %v350_v5, %v346_v4  ;;  %v1837_v15 = vpack.c.bf16 %v352_v9, %v348_v8  ;;  %v354_v16 = vld [vmem:[#allocation2 + $0x2c0] sm:$0xff] }
  0x6a   :  { %1758 = vmatpush1.bf16.msra.mxu1 %v1757_v30  ;;  %1822 = vmatpush1.bf16.msra.mxu0 %v1821_v31  ;;  %v359_v11 = vld [vmem:[#allocation2 + $0x2e8] sm:$0xff]  ;;  %v361_v13 = vld [vmem:[#allocation2 + $0x2f8] sm:$0xff]  ;;  %v358_v17 = vld [vmem:[#allocation2 + $0x2e0] sm:$0xff] }
  0x6b   :  { %1760 = vmatprep.subr.bf16.mxu1 %v1759_v34  ;;  %1824 = vmatprep.subr.bf16.mxu0 %v1823_v35  ;;  %v1775_v18 = vpack.c.bf16 %v359_v11, %v355_v10  ;;  %v1839_v19 = vpack.c.bf16 %v361_v13, %v357_v12  ;;  %v356_v20 = vld [vmem:[#allocation2 + $0x2d0] sm:$0xff]  ;;  %v363_v22 = vld [vmem:[#allocation2 + $0x308] sm:$0xff]  ;;  %v365_v24 = vld [vmem:[#allocation2 + $0x318] sm:$0xff]  ;;  %v1777_v26 = vpack.c.bf16 %v358_v17, %v354_v16 }
  0x6c   :  { %v360_v21 = vld [vmem:[#allocation2 + $0x2f0] sm:$0xff]  ;;  %v367_v23 = vld [vmem:[#allocation2 + $0x328] sm:$0xff]  ;;  %v369_v25 = vld [vmem:[#allocation2 + $0x338] sm:$0xff] }
  0x6d   :  { %v1841_v27 = vpack.c.bf16 %v360_v21, %v356_v20  ;;  %v362_v28 = vld [vmem:[#allocation2 + $0x300] sm:$0xff]  ;;  %v1779_v29 = vpack.c.bf16 %v367_v23, %v363_v22  ;;  %v1843_v30 = vpack.c.bf16 %v369_v25, %v365_v24  ;;  %v364_v32 = vld [vmem:[#allocation2 + $0x310] sm:$0xff]  ;;  %v371_v36 = vld [vmem:[#allocation2 + $0x348] sm:$0xff] }
  0x6e   :  { %1762 = vmatpush1.bf16.msra.mxu1 %v1761_v42  ;;  %1826 = vmatpush1.bf16.msra.mxu0 %v1825_v43  ;;  %v366_v31 = vld [vmem:[#allocation2 + $0x320] sm:$0xff]  ;;  %v368_v33 = vld [vmem:[#allocation2 + $0x330] sm:$0xff]  ;;  %v375_v37 = vld [vmem:[#allocation2 + $0x368] sm:$0xff] }
  0x6f   :  { %1764 = vmatprep.subr.bf16.mxu1 %v1763_v46  ;;  %1828 = vmatprep.subr.bf16.mxu0 %v1827_v47  ;;  %v1781_v34 = vpack.c.bf16 %v366_v31, %v362_v28  ;;  %v1845_v35 = vpack.c.bf16 %v368_v33, %v364_v32  ;;  %v373_v38 = vld [vmem:[#allocation2 + $0x358] sm:$0xff]  ;;  %v1783_v39 = vpack.c.bf16 %v375_v37, %v371_v36  ;;  %v370_v41 = vld [vmem:[#allocation2 + $0x340] sm:$0xff]  ;;  %v372_v45 = vld [vmem:[#allocation2 + $0x350] sm:$0xff] }
  0x70   :  { %v377_v40 = vld [vmem:[#allocation2 + $0x378] sm:$0xff]  ;;  %v374_v42 = vld [vmem:[#allocation2 + $0x360] sm:$0xff]  ;;  %v376_v46 = vld [vmem:[#allocation2 + $0x370] sm:$0xff] }
  0x71   :  { %v1847_v43 = vpack.c.bf16 %v377_v40, %v373_v38  ;;  %v1785_v44 = vpack.c.bf16 %v374_v42, %v370_v41  ;;  %v1849_v47 = vpack.c.bf16 %v376_v46, %v372_v45  ;;  %v379_v48 = vld [vmem:[#allocation2 + $0x388] sm:$0xff]  ;;  %v381_v50 = vld [vmem:[#allocation2 + $0x398] sm:$0xff]  ;;  %v378_v53 = vld [vmem:[#allocation2 + $0x380] sm:$0xff] }
  0x72   :  { %1766 = vmatpush1.bf16.msra.mxu1 %v1765_v54  ;;  %1830 = vmatpush1.bf16.msra.mxu0 %v1829_v55  ;;  %v383_v49 = vld [vmem:[#allocation2 + $0x3a8] sm:$0xff]  ;;  %v385_v52 = vld [vmem:[#allocation2 + $0x3b8] sm:$0xff]  ;;  %v382_v54 = vld [vmem:[#allocation2 + $0x3a0] sm:$0xff] }
  0x73   :  { %1768 = vmatprep.subr.bf16.mxu1 %v1767_v58  ;;  %1832 = vmatprep.subr.bf16.mxu0 %v1831_v59  ;;  %v1787_v51 = vpack.c.bf16 %v383_v49, %v379_v48  ;;  %v1851_v55 = vpack.c.bf16 %v385_v52, %v381_v50  ;;  %v1789_v56 = vpack.c.bf16 %v382_v54, %v378_v53  ;;  %v380_v57 = vld [vmem:[#allocation2 + $0x390] sm:$0xff]  ;;  %v387_v60 = vld [vmem:[#allocation2 + $0x3c8] sm:$0xff]  ;;  %v389_v62 = vld [vmem:[#allocation2 + $0x3d8] sm:$0xff] }
  0x74   :  { %v384_v58 = vld [vmem:[#allocation2 + $0x3b0] sm:$0xff]  ;;  %v391_v61 = vld [vmem:[#allocation2 + $0x3e8] sm:$0xff]  ;;  %v393_v0 = vld [vmem:[#allocation2 + $0x3f8] sm:$0xff] }
  0x75   :  { %v1853_v59 = vpack.c.bf16 %v384_v58, %v380_v57  ;;  %v1791_v63 = vpack.c.bf16 %v391_v61, %v387_v60  ;;  %v386_v1 = vld [vmem:[#allocation2 + $0x3c0] sm:$0xff]  ;;  %v388_v5 = vld [vmem:[#allocation2 + $0x3d0] sm:$0xff]  ;;  %v563_v8 = vld [vmem:[#allocation5 + $0x8] sm:$0xff] }
  0x76   :  { %1770 = vmatpush1.bf16.msra.mxu1 %v1769_v2  ;;  %1834 = vmatpush1.bf16.msra.mxu0 %v1833_v3  ;;  %v390_v2 = vld [vmem:[#allocation2 + $0x3e0] sm:$0xff]  ;;  %v1855_v3 = vpack.c.bf16 %v393_v0, %v389_v62  ;;  %v567_v9 = vld [vmem:[#allocation5 + $0x28] sm:$0xff]  ;;  %v565_v10 = vld [vmem:[#allocation5 + $0x18] sm:$0xff] }
  0x77   :  { %1772 = vmatprep.subr.bf16.mxu1 %v1771_v6  ;;  %1836 = vmatprep.subr.bf16.mxu0 %v1835_v7  ;;  %v1793_v4 = vpack.c.bf16 %v390_v2, %v386_v1  ;;  %v392_v6 = vld [vmem:[#allocation2 + $0x3f0] sm:$0xff]  ;;  %v1859_v11 = vpack.c.bf16 %v567_v9, %v563_v8  ;;  %v569_v12 = vld [vmem:[#allocation5 + $0x38] sm:$0xff]  ;;  %v112_v17 = vld [vmem:[%s2848_s3] ss:$4 sm:$0x3] }
  0x78   :  { %v1857_v7 = vpack.c.bf16 %v392_v6, %v388_v5  ;;  %v1987_v13 = vpack.c.bf16 %v569_v12, %v565_v10  ;;  %v1693_v21 = vld [vmem:[%s2848_s3 + $0x1] ss:$4 sm:$0x3]  ;;  %v1694_v22 = vld [vmem:[%s2848_s3 + $0x2] ss:$4 sm:$0x3] }
  0x79   :  { %v250_v33 = vld [vmem:[%s2849_s4] sm:$0x3]  ;;  %v564_v50 = vld [vmem:[#allocation5 + $0x10] sm:$0xff]  ;;  %v571_v52 = vld [vmem:[#allocation5 + $0x48] sm:$0xff] }
  0x7a   :  { %1774 = vmatpush1.bf16.msra.mxu1 %v1773_v14  ;;  %1838 = vmatpush1.bf16.msra.mxu0 %v1837_v15  ;;  %v119_v14 = vlaneseq  ;;  %v566_v48 = vld [vmem:[#allocation5 + $0x20] sm:$0xff]  ;;  %v575_v54 = vld [vmem:[#allocation5 + $0x68] sm:$0xff]  ;;  %v572_v1 = vld [vmem:[#allocation5 + $0x50] sm:$0xff] }
  0x7b   :  { %1776 = vmatprep.subr.bf16.mxu1 %v1775_v18  ;;  %1840 = vmatprep.subr.bf16.mxu0 %v1839_v19  ;;  %v570_v60 = vld [vmem:[#allocation5 + $0x40] sm:$0xff]  ;;  %v576_v2 = vld [vmem:[#allocation5 + $0x70] sm:$0xff]  ;;  %v581_v5 = vld [vmem:[#allocation5 + $0x98] sm:$0xff] }
  0x7c   :  { %v2641_v15 = vshrl.u32 %v119_v14, 7  ;;  %v574_v61 = vld [vmem:[#allocation5 + $0x60] sm:$0xff]  ;;  %v585_v6 = vld [vmem:[#allocation5 + $0xb8] sm:$0xff]  ;;  %v1993_v8 = vpack.c.bf16 %v576_v2, %v572_v1  ;;  %v584_v14 = vld [vmem:[#allocation5 + $0xb0] sm:$0xff] }
  0x7d   :  { %v578_v9 = vld [vmem:[#allocation5 + $0x80] sm:$0xff]  ;;  %v1995_v12 = vpack.c.bf16 %v585_v6, %v581_v5  ;;  %v612_v2 = vld [vmem:[#allocation5 + $0x190] sm:$0xff]  ;;  %v623_v5 = vld [vmem:[#allocation5 + $0x1e8] sm:$0xff] }
  0x7e   :  { %1778 = vmatpush1.bf16.msra.mxu1 %v1777_v26  ;;  %1842 = vmatpush1.bf16.msra.mxu0 %v1841_v27  ;;  %v2644_v16 = vsub.s32 0, %v2641_v15  ;;  %v2650_v18 = vsub.s32 1, %v2641_v15  ;;  %v582_v10 = vld [vmem:[#allocation5 + $0xa0] sm:$0xff]  ;;  %v621_v6 = vld [vmem:[#allocation5 + $0x1d8] sm:$0xff] }
  0x7f   :  { %1780 = vmatprep.subr.bf16.mxu1 %v1779_v29  ;;  %1844 = vmatprep.subr.bf16.mxu0 %v1843_v30 }
  0x80   :  { %v122_v20 = vrot.slane %v112_v17, %v2644_v16  ;;  %v126_v23 = vrot.slane %v112_v17, %v2650_v18  ;;  %v217_v25 = vrot.slane %v1693_v21, %v2644_v16  ;;  %v239_v26 = vrot.slane %v1694_v22, %v2644_v16  ;;  %v587_v17 = vld [vmem:[#allocation5 + $0xc8] sm:$0xff] }
  0x81   :  { %v221_v27 = vrot.slane %v1693_v21, %v2650_v18  ;;  %v243_v29 = vrot.slane %v1694_v22, %v2650_v18  ;;  %v255_v42 = vrot.slane %v250_v33, %v2644_v16  ;;  %v593_v21 = vld [vmem:[#allocation5 + $0xf8] sm:$0xff]  ;;  %v1869_v22 = vpack.c.bf16 %v582_v10, %v578_v9  ;;  %v618_v10 = vld [vmem:[#allocation5 + $0x1c0] sm:$0xff] }
  0x82   :  { %1782 = vmatpush1.bf16.msra.mxu1 %v1781_v34  ;;  %1846 = vmatpush1.bf16.msra.mxu0 %v1845_v35 }
  0x83   :  { %1784 = vmatprep.subr.bf16.mxu1 %v1783_v39  ;;  %1848 = vmatprep.subr.bf16.mxu0 %v1847_v43 }
  0x86   :  { %1786 = vmatpush1.bf16.msra.mxu1 %v1785_v44  ;;  %1850 = vmatpush1.bf16.msra.mxu0 %v1849_v47  ;;  %v259_v44 = vrot.slane %v250_v33, %v2650_v18  ;;  %v562_v47 = vld [vmem:[#allocation5] sm:$0xff]  ;;  %v601_v33 = vld [vmem:[#allocation5 + $0x138] sm:$0xff] }
  0x87   :  { %1788 = vmatprep.subr.bf16.mxu1 %v1787_v51  ;;  %1852 = vmatprep.subr.bf16.mxu0 %v1851_v55  ;;  %v568_v51 = vld [vmem:[#allocation5 + $0x30] sm:$0xff]  ;;  %v573_v55 = vld [vmem:[#allocation5 + $0x58] sm:$0xff]  ;;  %v1861_v58 = vpack.c.bf16 %v566_v48, %v562_v47  ;;  %v602_v48 = vld [vmem:[#allocation5 + $0x140] sm:$0xff] }
  0x8a   :  { %1790 = vmatpush1.bf16.msra.mxu1 %v1789_v56  ;;  %1854 = vmatpush1.bf16.msra.mxu0 %v1853_v59  ;;  %v577_v56 = vld [vmem:[#allocation5 + $0x78] sm:$0xff]  ;;  %v1989_v59 = vpack.c.bf16 %v568_v51, %v564_v50  ;;  %v606_v50 = vld [vmem:[#allocation5 + $0x160] sm:$0xff] }
  0x8b   :  { %1792 = vmatprep.subr.bf16.mxu1 %v1791_v63  ;;  %1856 = vmatprep.subr.bf16.mxu0 %v1855_v3  ;;  %v1863_v63 = vpack.c.bf16 %v575_v54, %v571_v52  ;;  %v1991_v0 = vpack.c.bf16 %v577_v56, %v573_v55  ;;  %v579_v3 = vld [vmem:[#allocation5 + $0x88] sm:$0xff]  ;;  %v604_v54 = vld [vmem:[#allocation5 + $0x150] sm:$0xff] }
  0x8c   :  { %v608_v55 = vld [vmem:[#allocation5 + $0x170] sm:$0xff]  ;;  %v611_v56 = vld [vmem:[#allocation5 + $0x188] sm:$0xff] }
  0x8e   :  { %1794 = vmatpush1.bf16.msra.mxu1 %v1793_v4  ;;  %1858 = vmatpush1.bf16.msra.mxu0 %v1857_v7  ;;  %v583_v4 = vld [vmem:[#allocation5 + $0xa8] sm:$0xff]  ;;  %v1865_v7 = vpack.c.bf16 %v574_v61, %v570_v60  ;;  %v1881_v60 = vpack.c.bf16 %v606_v50, %v602_v48  ;;  %v2009_v61 = vpack.c.bf16 %v608_v55, %v604_v54  ;;  %v642_v50 = vld [vmem:[#allocation5 + $0x280] sm:$0xff]  ;;  %v644_v55 = vld [vmem:[#allocation5 + $0x290] sm:$0xff] }
  0x8f   :  { %1860 = vmatprep.subr.bf16.mxu1 %v1859_v11  ;;  %1988 = vmatprep.subr.bf16.mxu0 %v1987_v13  ;;  %v1867_v11 = vpack.c.bf16 %v583_v4, %v579_v3  ;;  %v580_v13 = vld [vmem:[#allocation5 + $0x90] sm:$0xff]  ;;  %v619_v4 = vld [vmem:[#allocation5 + $0x1c8] sm:$0xff] }
  0x90   :  { %v616_v3 = vld [vmem:[#allocation5 + $0x1b0] sm:$0xff] }
  0x91   :  { %v2013_v9 = vpack.c.bf16 %v616_v3, %v612_v2  ;;  %v652_v3 = vld [vmem:[#allocation5 + $0x2d0] sm:$0xff] }
  0xcc   :  { %v116_v19 = vpop.permute.xlu0 %115 }
  0xcd   :  { %v129_v24 = vmul.f32 %v122_v20, %v116_v19  ;;  %v130_v31 = vmul.f32 %v126_v23, %v116_v19  ;;  %v591_v19 = vld [vmem:[#allocation5 + $0xe8] sm:$0xff]  ;;  %v589_v20 = vld [vmem:[#allocation5 + $0xd8] sm:$0xff]  ;;  %v1997_v23 = vpack.c.bf16 %v584_v14, %v580_v13  ;;  %v620_v14 = vld [vmem:[#allocation5 + $0x1d0] sm:$0xff] }
  0xd0   :  { %v211_v28 = vpop.permute.xlu0 %210  ;;  %v233_v30 = vpop.permute.xlu1 %232 }
  0xd1   :  { %v224_v34 = vmul.f32 %v217_v25, %v211_v28  ;;  %v246_v37 = vmul.f32 %v239_v26, %v233_v30  ;;  %v225_v38 = vmul.f32 %v221_v27, %v211_v28  ;;  %v247_v40 = vmul.f32 %v243_v29, %v233_v30  ;;  %v590_v25 = vld [vmem:[#allocation5 + $0xe0] sm:$0xff]  ;;  %v588_v28 = vld [vmem:[#allocation5 + $0xd0] sm:$0xff]  ;;  %v595_v30 = vld [vmem:[#allocation5 + $0x108] sm:$0xff] }
  0xd2   :  { %v1871_v26 = vpack.c.bf16 %v591_v19, %v587_v17  ;;  %v1999_v27 = vpack.c.bf16 %v593_v21, %v589_v20  ;;  %v592_v29 = vld [vmem:[#allocation5 + $0xf0] sm:$0xff]  ;;  %v627_v19 = vld [vmem:[#allocation5 + $0x208] sm:$0xff]  ;;  %v629_v21 = vld [vmem:[#allocation5 + $0x218] sm:$0xff] }
  0xd3   :  { %v624_v17 = vld [vmem:[#allocation5 + $0x1f0] sm:$0xff]  ;;  %v631_v20 = vld [vmem:[#allocation5 + $0x228] sm:$0xff] }
 0x121   :  { %v201_v32 = vpop.f32.mrb[0].mxu0 }
 0x122   :  { %v202_v35 = vadd.f32 %v201_v32, %v129_v24  ;;  %v203_v36 = vpop.f32.mrb[1].mxu0  ;;  %v586_v24 = vld [vmem:[#allocation5 + $0xc0] sm:$0xff]  ;;  %v597_v32 = vld [vmem:[#allocation5 + $0x118] sm:$0xff] }
 0x123   :  { %v204_v39 = vadd.f32 %v203_v36, %v130_v31  ;;  %v599_v31 = vld [vmem:[#allocation5 + $0x128] sm:$0xff]  ;;  %v594_v36 = vld [vmem:[#allocation5 + $0x100] sm:$0xff] }
 0x124   :  { %v226_v41 = vadd.f32 %v224_v34, %v202_v35  ;;  %v1873_v34 = vpack.c.bf16 %v590_v25, %v586_v24  ;;  %v2001_v35 = vpack.c.bf16 %v592_v29, %v588_v28  ;;  %v2017_v24 = vpack.c.bf16 %v624_v17, %v620_v14  ;;  %v626_v25 = vld [vmem:[#allocation5 + $0x200] sm:$0xff]  ;;  %v628_v29 = vld [vmem:[#allocation5 + $0x210] sm:$0xff] }
 0x125   :  { %v227_v43 = vadd.f32 %v225_v38, %v204_v39  ;;  %v1875_v38 = vpack.c.bf16 %v599_v31, %v595_v30  ;;  %v2003_v39 = vpack.c.bf16 %v601_v33, %v597_v32  ;;  %v632_v30 = vld [vmem:[#allocation5 + $0x230] sm:$0xff]  ;;  %v635_v31 = vld [vmem:[#allocation5 + $0x248] sm:$0xff]  ;;  %v637_v33 = vld [vmem:[#allocation5 + $0x258] sm:$0xff] }
 0x126   :  { %v248_v45 = vadd.f32 %v246_v37, %v226_v41  ;;  %v598_v37 = vld [vmem:[#allocation5 + $0x120] sm:$0xff]  ;;  %v600_v41 = vld [vmem:[#allocation5 + $0x130] sm:$0xff]  ;;  %v639_v32 = vld [vmem:[#allocation5 + $0x268] sm:$0xff] }
 0x127   :  { %v249_v46 = vadd.f32 %v247_v40, %v227_v43  ;;  %v596_v40 = vld [vmem:[#allocation5 + $0x110] sm:$0xff]  ;;  %v607_v43 = vld [vmem:[#allocation5 + $0x168] sm:$0xff] }
 0x128   :  { %v2669_v49 = vadd.f32 %v255_v42, %v248_v45  ;;  %v603_v42 = vld [vmem:[#allocation5 + $0x148] sm:$0xff]  ;;  %v609_v45 = vld [vmem:[#allocation5 + $0x178] sm:$0xff]  ;;  %v2005_v47 = vpack.c.bf16 %v600_v41, %v596_v40  ;;  %v636_v41 = vld [vmem:[#allocation5 + $0x250] sm:$0xff] }
 0x129   :  { %v2671_v53 = vadd.f32 %v259_v44, %v249_v46  ;;  %v605_v44 = vld [vmem:[#allocation5 + $0x158] sm:$0xff]  ;;  %v1877_v46 = vpack.c.bf16 %v598_v37, %v594_v36  ;;  %v1879_v51 = vpack.c.bf16 %v607_v43, %v603_v42  ;;  %v2021_v36 = vpack.c.bf16 %v632_v30, %v628_v29  ;;  %v634_v37 = vld [vmem:[#allocation5 + $0x240] sm:$0xff]  ;;  %v640_v42 = vld [vmem:[#allocation5 + $0x270] sm:$0xff] }
 0x12a   :  { %v264_v62 = vmax.f32 %v2669_v49, 0.0  ;;  %v2007_v52 = vpack.c.bf16 %v609_v45, %v605_v44  ;;  %v643_v43 = vld [vmem:[#allocation5 + $0x288] sm:$0xff]  ;;  %v645_v45 = vld [vmem:[#allocation5 + $0x298] sm:$0xff]  ;;  %v2025_v48 = vpack.c.bf16 %v640_v42, %v636_v41  ;;  %v660_v17 = vld [vmem:[#allocation5 + $0x310] sm:$0xff] }
 0x12b   :  { %v265_v57 = vmax.f32 %v2671_v53, 0.0  ;;  %v647_v44 = vld [vmem:[#allocation5 + $0x2a8] sm:$0xff]  ;;  %v668_v30 = vld [vmem:[#allocation5 + $0x350] sm:$0xff]  ;;  %v678_v41 = vld [vmem:[#allocation5 + $0x3a0] sm:$0xff] }
 0x12c   :  { %v676_v42 = vld [vmem:[#allocation5 + $0x390] sm:$0xff] }
 0x12d   :  { %480 = vmatprep.mubr.f32.mxu1 %v265_v57  ;;  %551 = vmatprep.mubr.f32.mxu0 %v265_v57  ;;  %v615_v57 = vld [vmem:[#allocation5 + $0x1a8] sm:$0xff] }
 0x12e   :  { %481 = vmatmul.mubr.f32.vlgmr.msra.gmra.mrb[0].mxu1 %v264_v62  ;;  %552 = vmatmul.mubr.f32.vlgmr.msra.gmra.mrb[2].mxu0 %v264_v62  ;;  %v610_v62 = vld [vmem:[#allocation5 + $0x180] sm:$0xff] }
 0x12f   :  { %1862 = vmatpush1.bf16.msra.mxu1 %v1861_v58  ;;  %1990 = vmatpush1.bf16.msra.mxu0 %v1989_v59  ;;  %v613_v58 = vld [vmem:[#allocation5 + $0x198] sm:$0xff] }
 0x130   :  { %1864 = vmatprep.subr.bf16.mxu1 %v1863_v63  ;;  %1992 = vmatprep.subr.bf16.mxu0 %v1991_v0  ;;  %v617_v59 = vld [vmem:[#allocation5 + $0x1b8] sm:$0xff]  ;;  %v614_v63 = vld [vmem:[#allocation5 + $0x1a0] sm:$0xff]  ;;  %v1883_v0 = vpack.c.bf16 %v615_v57, %v611_v56  ;;  %v648_v56 = vld [vmem:[#allocation5 + $0x2b0] sm:$0xff] }
 0x131   :  { %v2011_v1 = vpack.c.bf16 %v617_v59, %v613_v58  ;;  %v651_v57 = vld [vmem:[#allocation5 + $0x2c8] sm:$0xff]  ;;  %v653_v59 = vld [vmem:[#allocation5 + $0x2d8] sm:$0xff] }
 0x132   :  { %v655_v58 = vld [vmem:[#allocation5 + $0x2e8] sm:$0xff] }
 0x133   :  { %1866 = vmatpush1.bf16.msra.mxu1 %v1865_v7  ;;  %1994 = vmatpush1.bf16.msra.mxu0 %v1993_v8  ;;  %v625_v7 = vld [vmem:[#allocation5 + $0x1f8] sm:$0xff]  ;;  %v1885_v8 = vpack.c.bf16 %v614_v63, %v610_v62  ;;  %v2029_v62 = vpack.c.bf16 %v648_v56, %v644_v55  ;;  %v650_v63 = vld [vmem:[#allocation5 + $0x2c0] sm:$0xff] }
 0x134   :  { %1868 = vmatprep.subr.bf16.mxu1 %v1867_v11  ;;  %1996 = vmatprep.subr.bf16.mxu0 %v1995_v12  ;;  %v622_v11 = vld [vmem:[#allocation5 + $0x1e0] sm:$0xff]  ;;  %v1887_v12 = vpack.c.bf16 %v623_v5, %v619_v4  ;;  %v2015_v13 = vpack.c.bf16 %v625_v7, %v621_v6  ;;  %v656_v4 = vld [vmem:[#allocation5 + $0x2f0] sm:$0xff]  ;;  %v659_v5 = vld [vmem:[#allocation5 + $0x308] sm:$0xff] }
 0x135   :  { %v663_v6 = vld [vmem:[#allocation5 + $0x328] sm:$0xff]  ;;  %v661_v7 = vld [vmem:[#allocation5 + $0x318] sm:$0xff] }
 0x137   :  { %1870 = vmatpush1.bf16.msra.mxu1 %v1869_v22  ;;  %1998 = vmatpush1.bf16.msra.mxu0 %v1997_v23  ;;  %v633_v22 = vld [vmem:[#allocation5 + $0x238] sm:$0xff]  ;;  %v1889_v23 = vpack.c.bf16 %v622_v11, %v618_v10  ;;  %v2033_v10 = vpack.c.bf16 %v656_v4, %v652_v3  ;;  %v658_v11 = vld [vmem:[#allocation5 + $0x300] sm:$0xff]  ;;  %v410_v3 = vsub.s32 3, %v2641_v15 }
 0x138   :  { %1872 = vmatprep.subr.bf16.mxu1 %v1871_v26  ;;  %2000 = vmatprep.subr.bf16.mxu0 %v1999_v27  ;;  %v630_v26 = vld [vmem:[#allocation5 + $0x220] sm:$0xff]  ;;  %v1891_v27 = vpack.c.bf16 %v631_v20, %v627_v19  ;;  %v2019_v28 = vpack.c.bf16 %v633_v22, %v629_v21  ;;  %v664_v19 = vld [vmem:[#allocation5 + $0x330] sm:$0xff]  ;;  %v667_v20 = vld [vmem:[#allocation5 + $0x348] sm:$0xff] }
 0x139   :  { %v671_v21 = vld [vmem:[#allocation5 + $0x368] sm:$0xff]  ;;  %v669_v22 = vld [vmem:[#allocation5 + $0x358] sm:$0xff] }
 0x13b   :  { %1874 = vmatpush1.bf16.msra.mxu1 %v1873_v34  ;;  %2002 = vmatpush1.bf16.msra.mxu0 %v2001_v35  ;;  %v641_v34 = vld [vmem:[#allocation5 + $0x278] sm:$0xff]  ;;  %v1893_v35 = vpack.c.bf16 %v630_v26, %v626_v25  ;;  %v2037_v25 = vpack.c.bf16 %v664_v19, %v660_v17  ;;  %v666_v26 = vld [vmem:[#allocation5 + $0x340] sm:$0xff]  ;;  %v696_v17 = vld [vmem:[#allocation5 + $0x430] sm:$0xff] }
 0x13c   :  { %1876 = vmatprep.subr.bf16.mxu1 %v1875_v38  ;;  %2004 = vmatprep.subr.bf16.mxu0 %v2003_v39  ;;  %v638_v38 = vld [vmem:[#allocation5 + $0x260] sm:$0xff]  ;;  %v1895_v39 = vpack.c.bf16 %v639_v32, %v635_v31  ;;  %v2023_v40 = vpack.c.bf16 %v641_v34, %v637_v33  ;;  %v672_v31 = vld [vmem:[#allocation5 + $0x370] sm:$0xff]  ;;  %v675_v32 = vld [vmem:[#allocation5 + $0x388] sm:$0xff] }
 0x13d   :  { %v679_v33 = vld [vmem:[#allocation5 + $0x3a8] sm:$0xff]  ;;  %v677_v34 = vld [vmem:[#allocation5 + $0x398] sm:$0xff] }
 0x13f   :  { %1878 = vmatpush1.bf16.msra.mxu1 %v1877_v46  ;;  %2006 = vmatpush1.bf16.msra.mxu0 %v2005_v47  ;;  %v649_v46 = vld [vmem:[#allocation5 + $0x2b8] sm:$0xff]  ;;  %v1897_v47 = vpack.c.bf16 %v638_v38, %v634_v37  ;;  %v2041_v37 = vpack.c.bf16 %v672_v31, %v668_v30  ;;  %v674_v38 = vld [vmem:[#allocation5 + $0x380] sm:$0xff]  ;;  %v700_v31 = vld [vmem:[#allocation5 + $0x450] sm:$0xff] }
 0x140   :  { %1880 = vmatprep.subr.bf16.mxu1 %v1879_v51  ;;  %2008 = vmatprep.subr.bf16.mxu0 %v2007_v52  ;;  %v646_v51 = vld [vmem:[#allocation5 + $0x2a0] sm:$0xff]  ;;  %v1899_v52 = vpack.c.bf16 %v647_v44, %v643_v43  ;;  %v2027_v54 = vpack.c.bf16 %v649_v46, %v645_v45  ;;  %v680_v43 = vld [vmem:[#allocation5 + $0x3b0] sm:$0xff]  ;;  %v1917_v44 = vpack.c.bf16 %v678_v41, %v674_v38  ;;  %v683_v46 = vld [vmem:[#allocation5 + $0x3c8] sm:$0xff] }
 0x141   :  { %v2045_v45 = vpack.c.bf16 %v680_v43, %v676_v42  ;;  %v713_v38 = vld [vmem:[#allocation5 + $0x4b8] sm:$0xff]  ;;  %v706_v42 = vld [vmem:[#allocation5 + $0x480] sm:$0xff] }
 0x142   :  { %v710_v43 = vld [vmem:[#allocation5 + $0x4a0] sm:$0xff] }
 0x143   :  { %1882 = vmatpush1.bf16.msra.mxu1 %v1881_v60  ;;  %2010 = vmatpush1.bf16.msra.mxu0 %v2009_v61  ;;  %v657_v60 = vld [vmem:[#allocation5 + $0x2f8] sm:$0xff]  ;;  %v1901_v61 = vpack.c.bf16 %v646_v51, %v642_v50 }
 0x144   :  { %1884 = vmatprep.subr.bf16.mxu1 %v1883_v0  ;;  %2012 = vmatprep.subr.bf16.mxu0 %v2011_v1  ;;  %v654_v0 = vld [vmem:[#allocation5 + $0x2e0] sm:$0xff]  ;;  %v1903_v1 = vpack.c.bf16 %v655_v58, %v651_v57  ;;  %v2031_v2 = vpack.c.bf16 %v657_v60, %v653_v59  ;;  %v689_v51 = vld [vmem:[#allocation5 + $0x3f8] sm:$0xff]  ;;  %v684_v57 = vld [vmem:[#allocation5 + $0x3d0] sm:$0xff] }
 0x145   :  { %v688_v58 = vld [vmem:[#allocation5 + $0x3f0] sm:$0xff]  ;;  %v691_v60 = vld [vmem:[#allocation5 + $0x408] sm:$0xff] }
 0x146   :  { %v2049_v59 = vpack.c.bf16 %v688_v58, %v684_v57  ;;  %v718_v57 = vld [vmem:[#allocation5 + $0x4e0] sm:$0xff] }
 0x147   :  { %1886 = vmatpush1.bf16.msra.mxu1 %v1885_v8  ;;  %2014 = vmatpush1.bf16.msra.mxu0 %v2013_v9  ;;  %v665_v8 = vld [vmem:[#allocation5 + $0x338] sm:$0xff]  ;;  %v1905_v9 = vpack.c.bf16 %v654_v0, %v650_v63 }
 0x148   :  { %1888 = vmatprep.subr.bf16.mxu1 %v1887_v12  ;;  %2016 = vmatprep.subr.bf16.mxu0 %v2015_v13  ;;  %v662_v12 = vld [vmem:[#allocation5 + $0x320] sm:$0xff]  ;;  %v1907_v13 = vpack.c.bf16 %v663_v6, %v659_v5  ;;  %v2035_v14 = vpack.c.bf16 %v665_v8, %v661_v7  ;;  %v697_v0 = vld [vmem:[#allocation5 + $0x438] sm:$0xff] }
 0x14b   :  { %1890 = vmatpush1.bf16.msra.mxu1 %v1889_v23  ;;  %2018 = vmatpush1.bf16.msra.mxu0 %v2017_v24  ;;  %v673_v23 = vld [vmem:[#allocation5 + $0x378] sm:$0xff]  ;;  %v1909_v24 = vpack.c.bf16 %v662_v12, %v658_v11 }
 0x14c   :  { %1892 = vmatprep.subr.bf16.mxu1 %v1891_v27  ;;  %2020 = vmatprep.subr.bf16.mxu0 %v2019_v28  ;;  %v670_v27 = vld [vmem:[#allocation5 + $0x360] sm:$0xff]  ;;  %v1911_v28 = vpack.c.bf16 %v671_v21, %v667_v20  ;;  %v2039_v29 = vpack.c.bf16 %v673_v23, %v669_v22  ;;  %v699_v20 = vld [vmem:[#allocation5 + $0x448] sm:$0xff]  ;;  %v701_v23 = vld [vmem:[#allocation5 + $0x458] sm:$0xff] }
 0x14d   :  { %v703_v22 = vld [vmem:[#allocation5 + $0x468] sm:$0xff] }
 0x14f   :  { %1894 = vmatpush1.bf16.msra.mxu1 %v1893_v35  ;;  %2022 = vmatpush1.bf16.msra.mxu0 %v2021_v36  ;;  %v681_v35 = vld [vmem:[#allocation5 + $0x3b8] sm:$0xff]  ;;  %v1913_v36 = vpack.c.bf16 %v670_v27, %v666_v26 }
 0x150   :  { %1896 = vmatprep.subr.bf16.mxu1 %v1895_v39  ;;  %2024 = vmatprep.subr.bf16.mxu0 %v2023_v40  ;;  %v1915_v39 = vpack.c.bf16 %v679_v33, %v675_v32  ;;  %v2043_v40 = vpack.c.bf16 %v681_v35, %v677_v34  ;;  %v704_v32 = vld [vmem:[#allocation5 + $0x470] sm:$0xff]  ;;  %v707_v33 = vld [vmem:[#allocation5 + $0x488] sm:$0xff]  ;;  %v1927_v34 = vpack.c.bf16 %v703_v22, %v699_v20  ;;  %v730_v22 = vld [vmem:[#allocation5 + $0x540] sm:$0xff] }
 0x151   :  { %v2057_v41 = vpack.c.bf16 %v704_v32, %v700_v31  ;;  %v745_v31 = vld [vmem:[#allocation5 + $0x5b8] sm:$0xff] }
 0x153   :  { %1898 = vmatpush1.bf16.msra.mxu1 %v1897_v47  ;;  %2026 = vmatpush1.bf16.msra.mxu0 %v2025_v48  ;;  %v687_v47 = vld [vmem:[#allocation5 + $0x3e8] sm:$0xff]  ;;  %v685_v48 = vld [vmem:[#allocation5 + $0x3d8] sm:$0xff] }
 0x154   :  { %1900 = vmatprep.subr.bf16.mxu1 %v1899_v52  ;;  %2028 = vmatprep.subr.bf16.mxu0 %v2027_v54  ;;  %v1919_v50 = vpack.c.bf16 %v687_v47, %v683_v46  ;;  %v682_v52 = vld [vmem:[#allocation5 + $0x3c0] sm:$0xff]  ;;  %v2047_v55 = vpack.c.bf16 %v689_v51, %v685_v48  ;;  %v708_v46 = vld [vmem:[#allocation5 + $0x490] sm:$0xff]  ;;  %v715_v48 = vld [vmem:[#allocation5 + $0x4c8] sm:$0xff] }
 0x155   :  { %v686_v54 = vld [vmem:[#allocation5 + $0x3e0] sm:$0xff]  ;;  %v712_v47 = vld [vmem:[#allocation5 + $0x4b0] sm:$0xff]  ;;  %v717_v51 = vld [vmem:[#allocation5 + $0x4d8] sm:$0xff] }
 0x156   :  { %v1921_v56 = vpack.c.bf16 %v686_v54, %v682_v52  ;;  %v721_v52 = vld [vmem:[#allocation5 + $0x4f8] sm:$0xff]  ;;  %v1933_v54 = vpack.c.bf16 %v710_v43, %v706_v42 }
 0x157   :  { %1902 = vmatpush1.bf16.msra.mxu1 %v1901_v61  ;;  %2030 = vmatpush1.bf16.msra.mxu0 %v2029_v62  ;;  %v695_v61 = vld [vmem:[#allocation5 + $0x428] sm:$0xff]  ;;  %v693_v62 = vld [vmem:[#allocation5 + $0x418] sm:$0xff] }
 0x158   :  { %1904 = vmatprep.subr.bf16.mxu1 %v1903_v1  ;;  %2032 = vmatprep.subr.bf16.mxu0 %v2031_v2  ;;  %v1923_v63 = vpack.c.bf16 %v695_v61, %v691_v60  ;;  %v2051_v1 = vpack.c.bf16 %v697_v0, %v693_v62  ;;  %v2678_v2 = vld [vmem:[%s2851_s6] sm:$0xf]  ;;  %v716_v60 = vld [vmem:[#allocation5 + $0x4d0] sm:$0xff]  ;;  %v723_v62 = vld [vmem:[#allocation5 + $0x508] sm:$0xff] }
 0x159   :  { %v399_v4 = vrot.slane %v2678_v2, %v2644_v16  ;;  %v403_v5 = vrot.slane %v2678_v2, %v2650_v18  ;;  %v411_v6 = vrot.slane %v2678_v2, %v410_v3  ;;  %v720_v61 = vld [vmem:[#allocation5 + $0x4f0] sm:$0xff]  ;;  %v725_v0 = vld [vmem:[#allocation5 + $0x518] sm:$0xff] }
 0x15a   :  { %v749_v42 = vld [vmem:[#allocation5 + $0x5d8] sm:$0xff] }
 0x15b   :  { %1906 = vmatpush1.bf16.msra.mxu1 %v1905_v9  ;;  %2034 = vmatpush1.bf16.msra.mxu0 %v2033_v10  ;;  %v690_v9 = vld [vmem:[#allocation5 + $0x400] sm:$0xff]  ;;  %v753_v43 = vld [vmem:[#allocation5 + $0x5f8] sm:$0xff] }
 0x15c   :  { %1908 = vmatprep.subr.bf16.mxu1 %v1907_v13  ;;  %2036 = vmatprep.subr.bf16.mxu0 %v2035_v14  ;;  %v694_v13 = vld [vmem:[#allocation5 + $0x420] sm:$0xff]  ;;  %v692_v14 = vld [vmem:[#allocation5 + $0x410] sm:$0xff] }
 0x15d   :  { %v1925_v26 = vpack.c.bf16 %v694_v13, %v690_v9  ;;  %v2053_v27 = vpack.c.bf16 %v696_v17, %v692_v14  ;;  %v731_v13 = vld [vmem:[#allocation5 + $0x548] sm:$0xff]  ;;  %v733_v17 = vld [vmem:[#allocation5 + $0x558] sm:$0xff] }
 0x15e   :  { %v735_v14 = vld [vmem:[#allocation5 + $0x568] sm:$0xff] }
 0x15f   :  { %1910 = vmatpush1.bf16.msra.mxu1 %v1909_v24  ;;  %2038 = vmatpush1.bf16.msra.mxu0 %v2037_v25  ;;  %v705_v24 = vld [vmem:[#allocation5 + $0x478] sm:$0xff] }
 0x160   :  { %1912 = vmatprep.subr.bf16.mxu1 %v1911_v28  ;;  %2040 = vmatprep.subr.bf16.mxu0 %v2039_v29  ;;  %v698_v28 = vld [vmem:[#allocation5 + $0x440] sm:$0xff]  ;;  %v2055_v35 = vpack.c.bf16 %v705_v24, %v701_v23  ;;  %v1943_v24 = vpack.c.bf16 %v735_v14, %v731_v13 }
 0x161   :  { %v702_v29 = vld [vmem:[#allocation5 + $0x460] sm:$0xff] }
 0x162   :  { %v734_v23 = vld [vmem:[#allocation5 + $0x560] sm:$0xff] }
 0x163   :  { %1914 = vmatpush1.bf16.msra.mxu1 %v1913_v36  ;;  %2042 = vmatpush1.bf16.msra.mxu0 %v2041_v37  ;;  %v711_v36 = vld [vmem:[#allocation5 + $0x4a8] sm:$0xff]  ;;  %v709_v37 = vld [vmem:[#allocation5 + $0x498] sm:$0xff]  ;;  %v1945_v32 = vpack.c.bf16 %v734_v23, %v730_v22 }
 0x164   :  { %1916 = vmatprep.subr.bf16.mxu1 %v1915_v39  ;;  %2044 = vmatprep.subr.bf16.mxu0 %v2043_v40  ;;  %v1929_v40 = vpack.c.bf16 %v702_v29, %v698_v28  ;;  %v739_v28 = vld [vmem:[#allocation5 + $0x588] sm:$0xff]  ;;  %v773_v22 = vld [vmem:[#allocation5 + $0x698] sm:$0xff] }
 0x165   :  { %v743_v29 = vld [vmem:[#allocation5 + $0x5a8] sm:$0xff]  ;;  %v777_v23 = vld [vmem:[#allocation5 + $0x6b8] sm:$0xff] }
 0x167   :  { %1918 = vmatpush1.bf16.msra.mxu1 %v1917_v44  ;;  %2046 = vmatpush1.bf16.msra.mxu0 %v2045_v45  ;;  %v1931_v44 = vpack.c.bf16 %v711_v36, %v707_v33  ;;  %v2059_v45 = vpack.c.bf16 %v713_v38, %v709_v37  ;;  %v1947_v36 = vpack.c.bf16 %v743_v29, %v739_v28  ;;  %v740_v38 = vld [vmem:[#allocation5 + $0x590] sm:$0xff] }
 0x168   :  { %1920 = vmatprep.subr.bf16.mxu1 %v1919_v50  ;;  %2048 = vmatprep.subr.bf16.mxu0 %v2047_v55  ;;  %v719_v50 = vld [vmem:[#allocation5 + $0x4e8] sm:$0xff]  ;;  %v2061_v55 = vpack.c.bf16 %v712_v47, %v708_v46  ;;  %v746_v46 = vld [vmem:[#allocation5 + $0x5c0] sm:$0xff]  ;;  %v2091_v29 = vpack.c.bf16 %v777_v23, %v773_v22  ;;  %v804_v23 = vld [vmem:[#allocation5 + $0x790] sm:$0xff] }
 0x169   :  { %v1935_v58 = vpack.c.bf16 %v719_v50, %v715_v48  ;;  %v750_v47 = vld [vmem:[#allocation5 + $0x5e0] sm:$0xff]  ;;  %v2079_v50 = vpack.c.bf16 %v753_v43, %v749_v42  ;;  %v780_v42 = vld [vmem:[#allocation5 + $0x6d0] sm:$0xff] }
 0x16a   :  { %v784_v43 = vld [vmem:[#allocation5 + $0x6f0] sm:$0xff] }
 0x16b   :  { %1922 = vmatpush1.bf16.msra.mxu1 %v1921_v56  ;;  %2050 = vmatpush1.bf16.msra.mxu0 %v2049_v59  ;;  %v714_v56 = vld [vmem:[#allocation5 + $0x4c0] sm:$0xff]  ;;  %v2063_v59 = vpack.c.bf16 %v721_v52, %v717_v51  ;;  %v748_v51 = vld [vmem:[#allocation5 + $0x5d0] sm:$0xff] }
 0x16c   :  { %1924 = vmatprep.subr.bf16.mxu1 %v1923_v63  ;;  %2052 = vmatprep.subr.bf16.mxu0 %v2051_v1  ;;  %v727_v63 = vld [vmem:[#allocation5 + $0x528] sm:$0xff]  ;;  %v729_v1 = vld [vmem:[#allocation5 + $0x538] sm:$0xff]  ;;  %v752_v52 = vld [vmem:[#allocation5 + $0x5f0] sm:$0xff] }
 0x16d   :  { %v1939_v9 = vpack.c.bf16 %v727_v63, %v723_v62 }
 0x201   :  { %v482_v7 = vpop.f32.mrb[0].mxu1  ;;  %v2688_v8 = vpop.f32.mrb[2].mxu0 }
 0x202   :  { %v483_v10 = vadd.f32 %v482_v7, %v399_v4  ;;  %v484_v11 = vpop.f32.mrb[1].mxu1  ;;  %v555_v12 = vpop.f32.mrb[3].mxu0  ;;  %v1937_v4 = vpack.c.bf16 %v718_v57, %v714_v56  ;;  %v726_v7 = vld [vmem:[#allocation5 + $0x520] sm:$0xff]  ;;  %v757_v56 = vld [vmem:[#allocation5 + $0x618] sm:$0xff] }
 0x203   :  { %v485_v19 = vadd.f32 %v484_v11, %v403_v5  ;;  %v556_v21 = vadd.f32 %v555_v12, %v411_v6  ;;  %v2065_v5 = vpack.c.bf16 %v720_v61, %v716_v60  ;;  %v722_v6 = vld [vmem:[#allocation5 + $0x500] sm:$0xff]  ;;  %v724_v11 = vld [vmem:[#allocation5 + $0x510] sm:$0xff]  ;;  %v761_v57 = vld [vmem:[#allocation5 + $0x638] sm:$0xff] }
 0x204   :  { %v558_v30 = vmax.f32 %v483_v10, 0.0  ;;  %v2067_v10 = vpack.c.bf16 %v729_v1, %v725_v0  ;;  %v728_v12 = vld [vmem:[#allocation5 + $0x530] sm:$0xff]  ;;  %v1941_v20 = vpack.c.bf16 %v726_v7, %v722_v6  ;;  %v754_v60 = vld [vmem:[#allocation5 + $0x600] sm:$0xff]  ;;  %v2083_v63 = vpack.c.bf16 %v761_v57, %v757_v56  ;;  %v765_v6 = vld [vmem:[#allocation5 + $0x658] sm:$0xff] }
 0x205   :  { %v559_v25 = vmax.f32 %v485_v19, 0.0  ;;  %v561_v39 = vmax.f32 %v556_v21, 0.0  ;;  %v737_v19 = vld [vmem:[#allocation5 + $0x578] sm:$0xff]  ;;  %v2069_v21 = vpack.c.bf16 %v728_v12, %v724_v11  ;;  %v758_v61 = vld [vmem:[#allocation5 + $0x620] sm:$0xff]  ;;  %v756_v0 = vld [vmem:[#allocation5 + $0x610] sm:$0xff] }
 0x206   :  { %v760_v1 = vld [vmem:[#allocation5 + $0x630] sm:$0xff]  ;;  %v769_v7 = vld [vmem:[#allocation5 + $0x678] sm:$0xff]  ;;  %v762_v11 = vld [vmem:[#allocation5 + $0x640] sm:$0xff] }
 0x207   :  { %904 = vmatprep.mubr.f32.mxu1 %v559_v25  ;;  %1046 = vmatprep.mubr.f32.mxu0 %v559_v25  ;;  %v2071_v25 = vpack.c.bf16 %v737_v19, %v733_v17  ;;  %v766_v12 = vld [vmem:[#allocation5 + $0x660] sm:$0xff]  ;;  %v2087_v14 = vpack.c.bf16 %v769_v7, %v765_v6  ;;  %v764_v17 = vld [vmem:[#allocation5 + $0x650] sm:$0xff] }
 0x208   :  { %905 = vmatmul.mubr.f32.vlgmr.msra.gmra.mrb[2].mxu1 %v558_v30  ;;  %1047 = vmatmul.mubr.f32.vlgmr.msra.gmra.mrb[4].mxu0 %v558_v30  ;;  %v741_v30 = vld [vmem:[#allocation5 + $0x598] sm:$0xff]  ;;  %v768_v19 = vld [vmem:[#allocation5 + $0x670] sm:$0xff] }
 0x209   :  { %1926 = vmatpush1.bf16.msra.mxu1 %v1925_v26  ;;  %2054 = vmatpush1.bf16.msra.mxu0 %v2053_v27  ;;  %v732_v26 = vld [vmem:[#allocation5 + $0x550] sm:$0xff]  ;;  %v2075_v37 = vpack.c.bf16 %v745_v31, %v741_v30 }
 0x20a   :  { %975 = vmatprep.mubr.f32.mxu1 %v561_v39  ;;  %1117 = vmatprep.mubr.f32.mxu0 %v561_v39  ;;  %v736_v27 = vld [vmem:[#allocation5 + $0x570] sm:$0xff] }
 0x20b   :  { %1928 = vmatprep.subr.bf16.mxu1 %v1927_v34  ;;  %2056 = vmatprep.subr.bf16.mxu0 %v2055_v35  ;;  %v2073_v33 = vpack.c.bf16 %v736_v27, %v732_v26  ;;  %v738_v34 = vld [vmem:[#allocation5 + $0x580] sm:$0xff]  ;;  %v744_v39 = vld [vmem:[#allocation5 + $0x5b0] sm:$0xff] }
 0x20c   :  { %v742_v35 = vld [vmem:[#allocation5 + $0x5a0] sm:$0xff]  ;;  %v772_v30 = vld [vmem:[#allocation5 + $0x690] sm:$0xff] }
 0x20d   :  { %1930 = vmatpush1.bf16.msra.mxu1 %v1929_v40  ;;  %2058 = vmatpush1.bf16.msra.mxu0 %v2057_v41  ;;  %v747_v40 = vld [vmem:[#allocation5 + $0x5c8] sm:$0xff]  ;;  %v770_v26 = vld [vmem:[#allocation5 + $0x680] sm:$0xff]  ;;  %v776_v31 = vld [vmem:[#allocation5 + $0x6b0] sm:$0xff] }
 0x20e   :  { %1932 = vmatprep.subr.bf16.mxu1 %v1931_v44  ;;  %2060 = vmatprep.subr.bf16.mxu0 %v2059_v45  ;;  %v751_v41 = vld [vmem:[#allocation5 + $0x5e8] sm:$0xff]  ;;  %v1949_v44 = vpack.c.bf16 %v742_v35, %v738_v34  ;;  %v2077_v45 = vpack.c.bf16 %v744_v39, %v740_v38  ;;  %v774_v27 = vld [vmem:[#allocation5 + $0x6a0] sm:$0xff]  ;;  %v781_v34 = vld [vmem:[#allocation5 + $0x6d8] sm:$0xff] }
 0x20f   :  { %v1951_v48 = vpack.c.bf16 %v751_v41, %v747_v40  ;;  %v785_v35 = vld [vmem:[#allocation5 + $0x6f8] sm:$0xff]  ;;  %v778_v38 = vld [vmem:[#allocation5 + $0x6c0] sm:$0xff]  ;;  %v788_v56 = vld [vmem:[#allocation5 + $0x710] sm:$0xff] }
 0x210   :  { %v782_v39 = vld [vmem:[#allocation5 + $0x6e0] sm:$0xff]  ;;  %v2095_v41 = vpack.c.bf16 %v785_v35, %v781_v34  ;;  %v792_v57 = vld [vmem:[#allocation5 + $0x730] sm:$0xff] }
 0x211   :  { %1934 = vmatpush1.bf16.msra.mxu1 %v1933_v54  ;;  %2062 = vmatpush1.bf16.msra.mxu0 %v2061_v55  ;;  %v755_v54 = vld [vmem:[#allocation5 + $0x608] sm:$0xff]  ;;  %v796_v6 = vld [vmem:[#allocation5 + $0x750] sm:$0xff]  ;;  %v814_v35 = vld [vmem:[#allocation5 + $0x7e0] sm:$0xff] }
 0x212   :  { %1936 = vmatprep.subr.bf16.mxu1 %v1935_v58  ;;  %2064 = vmatprep.subr.bf16.mxu0 %v2063_v59  ;;  %v759_v55 = vld [vmem:[#allocation5 + $0x628] sm:$0xff]  ;;  %v1953_v58 = vpack.c.bf16 %v750_v47, %v746_v46  ;;  %v2081_v59 = vpack.c.bf16 %v752_v52, %v748_v51  ;;  %v789_v46 = vld [vmem:[#allocation5 + $0x718] sm:$0xff]  ;;  %v786_v51 = vld [vmem:[#allocation5 + $0x700] sm:$0xff] }
 0x213   :  { %v1955_v62 = vpack.c.bf16 %v759_v55, %v755_v54  ;;  %v793_v47 = vld [vmem:[#allocation5 + $0x738] sm:$0xff]  ;;  %v790_v52 = vld [vmem:[#allocation5 + $0x720] sm:$0xff]  ;;  %v800_v7 = vld [vmem:[#allocation5 + $0x770] sm:$0xff] }
 0x214   :  { %v2099_v55 = vpack.c.bf16 %v793_v47, %v789_v46  ;;  %v1135_v46 = vld [vmem:[#allocation7 + $0x38] sm:$0xff] }
 0x215   :  { %1938 = vmatpush1.bf16.msra.mxu1 %v1937_v4  ;;  %2066 = vmatpush1.bf16.msra.mxu0 %v2065_v5  ;;  %v763_v4 = vld [vmem:[#allocation5 + $0x648] sm:$0xff] }
 0x216   :  { %1940 = vmatprep.subr.bf16.mxu1 %v1939_v9  ;;  %2068 = vmatprep.subr.bf16.mxu0 %v2067_v10  ;;  %v767_v5 = vld [vmem:[#allocation5 + $0x668] sm:$0xff]  ;;  %v1957_v9 = vpack.c.bf16 %v758_v61, %v754_v60  ;;  %v2085_v10 = vpack.c.bf16 %v760_v1, %v756_v0  ;;  %v797_v60 = vld [vmem:[#allocation5 + $0x758] sm:$0xff]  ;;  %v794_v0 = vld [vmem:[#allocation5 + $0x740] sm:$0xff] }
 0x217   :  { %v1959_v13 = vpack.c.bf16 %v767_v5, %v763_v4  ;;  %v801_v61 = vld [vmem:[#allocation5 + $0x778] sm:$0xff]  ;;  %v798_v1 = vld [vmem:[#allocation5 + $0x760] sm:$0xff] }
 0x218   :  { %v2103_v5 = vpack.c.bf16 %v801_v61, %v797_v60  ;;  %v1143_v60 = vld [vmem:[#allocation7 + $0x78] sm:$0xff] }
 0x219   :  { %1942 = vmatpush1.bf16.msra.mxu1 %v1941_v20  ;;  %2070 = vmatpush1.bf16.msra.mxu0 %v2069_v21  ;;  %v771_v20 = vld [vmem:[#allocation5 + $0x688] sm:$0xff] }
 0x21a   :  { %1944 = vmatprep.subr.bf16.mxu1 %v1943_v24  ;;  %2072 = vmatprep.subr.bf16.mxu0 %v2071_v25  ;;  %v775_v21 = vld [vmem:[#allocation5 + $0x6a8] sm:$0xff]  ;;  %v1961_v24 = vpack.c.bf16 %v766_v12, %v762_v11  ;;  %v2089_v25 = vpack.c.bf16 %v768_v19, %v764_v17  ;;  %v805_v11 = vld [vmem:[#allocation5 + $0x798] sm:$0xff]  ;;  %v802_v17 = vld [vmem:[#allocation5 + $0x780] sm:$0xff] }
 0x21b   :  { %v1963_v28 = vpack.c.bf16 %v775_v21, %v771_v20  ;;  %v809_v12 = vld [vmem:[#allocation5 + $0x7b8] sm:$0xff]  ;;  %v806_v19 = vld [vmem:[#allocation5 + $0x7a0] sm:$0xff]  ;;  %v406_v20 = vsub.s32 2, %v2641_v15 }
 0x21c   :  { %v2107_v22 = vpack.c.bf16 %v809_v12, %v805_v11  ;;  %v1151_v11 = vld [vmem:[#allocation7 + $0xb8] sm:$0xff] }
 0x21d   :  { %1946 = vmatpush1.bf16.msra.mxu1 %v1945_v32  ;;  %2074 = vmatpush1.bf16.msra.mxu0 %v2073_v33  ;;  %v779_v32 = vld [vmem:[#allocation5 + $0x6c8] sm:$0xff] }
 0x21e   :  { %1948 = vmatprep.subr.bf16.mxu1 %v1947_v36  ;;  %2076 = vmatprep.subr.bf16.mxu0 %v2075_v37  ;;  %v783_v33 = vld [vmem:[#allocation5 + $0x6e8] sm:$0xff]  ;;  %v1965_v36 = vpack.c.bf16 %v774_v27, %v770_v26  ;;  %v2093_v37 = vpack.c.bf16 %v776_v31, %v772_v30  ;;  %v813_v27 = vld [vmem:[#allocation5 + $0x7d8] sm:$0xff]  ;;  %v810_v31 = vld [vmem:[#allocation5 + $0x7c0] sm:$0xff] }
 0x21f   :  { %v1967_v40 = vpack.c.bf16 %v783_v33, %v779_v32  ;;  %v815_v26 = vld [vmem:[#allocation5 + $0x7e8] sm:$0xff]  ;;  %v407_v32 = vrot.slane %v2678_v2, %v406_v20  ;;  %v1130_v2 = vld [vmem:[#allocation7 + $0x10] sm:$0xff] }
 0x221   :  { %1950 = vmatpush1.bf16.msra.mxu1 %v1949_v44  ;;  %2078 = vmatpush1.bf16.msra.mxu0 %v2077_v45  ;;  %v787_v44 = vld [vmem:[#allocation5 + $0x708] sm:$0xff] }
 0x222   :  { %1952 = vmatprep.subr.bf16.mxu1 %v1951_v48  ;;  %2080 = vmatprep.subr.bf16.mxu0 %v2079_v50  ;;  %v791_v45 = vld [vmem:[#allocation5 + $0x728] sm:$0xff]  ;;  %v1969_v48 = vpack.c.bf16 %v782_v39, %v778_v38  ;;  %v2097_v50 = vpack.c.bf16 %v784_v43, %v780_v42  ;;  %v1131_v39 = vld [vmem:[#allocation7 + $0x18] sm:$0xff]  ;;  %v554_v42 = vadd.f32 %v2688_v8, %v407_v32 }
 0x223   :  { %v1971_v54 = vpack.c.bf16 %v791_v45, %v787_v44  ;;  %v1129_v38 = vld [vmem:[#allocation7 + $0x8] sm:$0xff]  ;;  %v1128_v44 = vld [vmem:[#allocation7] sm:$0xff] }
 0x224   :  { %v2115_v43 = vpack.c.bf16 %v1131_v39, %v1129_v38  ;;  %v1133_v45 = vld [vmem:[#allocation7 + $0x28] sm:$0xff]  ;;  %v2117_v47 = vpack.c.bf16 %v1130_v2, %v1128_v44  ;;  %v1167_v39 = vld [vmem:[#allocation7 + $0x138] sm:$0xff] }
 0x225   :  { %1954 = vmatpush1.bf16.msra.mxu1 %v1953_v58  ;;  %2082 = vmatpush1.bf16.msra.mxu0 %v2081_v59  ;;  %v795_v58 = vld [vmem:[#allocation5 + $0x748] sm:$0xff]  ;;  %v1171_v2 = vld [vmem:[#allocation7 + $0x158] sm:$0xff] }
 0x226   :  { %1956 = vmatprep.subr.bf16.mxu1 %v1955_v62  ;;  %2084 = vmatprep.subr.bf16.mxu0 %v2083_v63  ;;  %v799_v59 = vld [vmem:[#allocation5 + $0x768] sm:$0xff]  ;;  %v1973_v62 = vpack.c.bf16 %v790_v52, %v786_v51  ;;  %v2101_v63 = vpack.c.bf16 %v792_v57, %v788_v56  ;;  %v1132_v51 = vld [vmem:[#allocation7 + $0x20] sm:$0xff]  ;;  %v1134_v52 = vld [vmem:[#allocation7 + $0x30] sm:$0xff] }
 0x227   :  { %v1975_v4 = vpack.c.bf16 %v799_v59, %v795_v58  ;;  %v2121_v8 = vpack.c.bf16 %v1134_v52, %v1132_v51  ;;  %v1136_v57 = vld [vmem:[#allocation7 + $0x40] sm:$0xff]  ;;  %v1138_v58 = vld [vmem:[#allocation7 + $0x50] sm:$0xff]  ;;  %v1141_v59 = vld [vmem:[#allocation7 + $0x68] sm:$0xff] }
 0x228   :  { %v2125_v61 = vpack.c.bf16 %v1138_v58, %v1136_v57  ;;  %v1161_v32 = vld [vmem:[#allocation7 + $0x108] sm:$0xff]  ;;  %v1175_v51 = vld [vmem:[#allocation7 + $0x178] sm:$0xff] }
 0x229   :  { %1958 = vmatpush1.bf16.msra.mxu1 %v1957_v9  ;;  %2086 = vmatpush1.bf16.msra.mxu0 %v2085_v10  ;;  %v803_v9 = vld [vmem:[#allocation5 + $0x788] sm:$0xff]  ;;  %v1179_v57 = vld [vmem:[#allocation7 + $0x198] sm:$0xff] }
 0x22a   :  { %1960 = vmatprep.subr.bf16.mxu1 %v1959_v13  ;;  %2088 = vmatprep.subr.bf16.mxu0 %v2087_v14  ;;  %v807_v10 = vld [vmem:[#allocation5 + $0x7a8] sm:$0xff]  ;;  %v1977_v13 = vpack.c.bf16 %v798_v1, %v794_v0  ;;  %v2105_v14 = vpack.c.bf16 %v800_v7, %v796_v6  ;;  %v1142_v0 = vld [vmem:[#allocation7 + $0x70] sm:$0xff]  ;;  %v1144_v7 = vld [vmem:[#allocation7 + $0x80] sm:$0xff] }
 0x22b   :  { %v1979_v21 = vpack.c.bf16 %v807_v10, %v803_v9  ;;  %v1145_v1 = vld [vmem:[#allocation7 + $0x88] sm:$0xff]  ;;  %v1146_v9 = vld [vmem:[#allocation7 + $0x90] sm:$0xff] }
 0x22c   :  { %v1149_v10 = vld [vmem:[#allocation7 + $0xa8] sm:$0xff]  ;;  %v2133_v12 = vpack.c.bf16 %v1146_v9, %v1144_v7  ;;  %v1187_v7 = vld [vmem:[#allocation7 + $0x1d8] sm:$0xff] }
 0x22d   :  { %1962 = vmatpush1.bf16.msra.mxu1 %v1961_v24  ;;  %2090 = vmatpush1.bf16.msra.mxu0 %v2089_v25  ;;  %v808_v24 = vld [vmem:[#allocation5 + $0x7b0] sm:$0xff]  ;;  %v811_v25 = vld [vmem:[#allocation5 + $0x7c8] sm:$0xff] }
 0x22e   :  { %1964 = vmatprep.subr.bf16.mxu1 %v1963_v28  ;;  %2092 = vmatprep.subr.bf16.mxu0 %v2091_v29  ;;  %v817_v28 = vld [vmem:[#allocation5 + $0x7f8] sm:$0xff]  ;;  %v1981_v29 = vpack.c.bf16 %v806_v19, %v802_v17  ;;  %v2109_v30 = vpack.c.bf16 %v808_v24, %v804_v23  ;;  %v1983_v33 = vpack.c.bf16 %v815_v26, %v811_v25  ;;  %v1150_v17 = vld [vmem:[#allocation7 + $0xb0] sm:$0xff]  ;;  %v1153_v19 = vld [vmem:[#allocation7 + $0xc8] sm:$0xff] }
 0x22f   :  { %v2111_v34 = vpack.c.bf16 %v817_v28, %v813_v27  ;;  %v1152_v24 = vld [vmem:[#allocation7 + $0xc0] sm:$0xff]  ;;  %v1154_v25 = vld [vmem:[#allocation7 + $0xd0] sm:$0xff]  ;;  %v1157_v26 = vld [vmem:[#allocation7 + $0xe8] sm:$0xff] }
 0x230   :  { %v1159_v27 = vld [vmem:[#allocation7 + $0xf8] sm:$0xff]  ;;  %v2141_v28 = vpack.c.bf16 %v1154_v25, %v1152_v24  ;;  %v1165_v38 = vld [vmem:[#allocation7 + $0x128] sm:$0xff] }
 0x231   :  { %1966 = vmatpush1.bf16.msra.mxu1 %v1965_v36  ;;  %2094 = vmatpush1.bf16.msra.mxu0 %v2093_v37  ;;  %v812_v36 = vld [vmem:[#allocation5 + $0x7d0] sm:$0xff]  ;;  %v1169_v44 = vld [vmem:[#allocation7 + $0x148] sm:$0xff]  ;;  %v1195_v25 = vld [vmem:[#allocation7 + $0x218] sm:$0xff] }
 0x232   :  { %1968 = vmatprep.subr.bf16.mxu1 %v1967_v40  ;;  %2096 = vmatprep.subr.bf16.mxu0 %v2095_v41  ;;  %v816_v37 = vld [vmem:[#allocation5 + $0x7f0] sm:$0xff]  ;;  %v1985_v40 = vpack.c.bf16 %v814_v35, %v810_v31  ;;  %v1193_v24 = vld [vmem:[#allocation7 + $0x208] sm:$0xff] }
 0x233   :  { %v2113_v41 = vpack.c.bf16 %v816_v37, %v812_v36  ;;  %v1158_v31 = vld [vmem:[#allocation7 + $0xf0] sm:$0xff]  ;;  %v1160_v36 = vld [vmem:[#allocation7 + $0x100] sm:$0xff] }
 0x234   :  { %v1162_v37 = vld [vmem:[#allocation7 + $0x110] sm:$0xff] }
 0x235   :  { %1970 = vmatpush1.bf16.msra.mxu1 %v1969_v48  ;;  %2098 = vmatpush1.bf16.msra.mxu0 %v2097_v50  ;;  %v560_v48 = vmax.f32 %v554_v42, 0.0  ;;  %v2119_v50 = vpack.c.bf16 %v1135_v46, %v1133_v45  ;;  %v1164_v42 = vld [vmem:[#allocation7 + $0x120] sm:$0xff]  ;;  %v2155_v46 = vpack.c.bf16 %v1171_v2, %v1169_v44  ;;  %v1427_v44 = vld [vmem:[#allocation8 + $0x68] sm:$0xff]  ;;  %v1429_v2 = vld [vmem:[#allocation8 + $0x78] sm:$0xff] }
 0x236   :  { %1972 = vmatprep.subr.bf16.mxu1 %v1971_v54  ;;  %2100 = vmatprep.subr.bf16.mxu0 %v2099_v55  ;;  %v1137_v54 = vld [vmem:[#allocation7 + $0x48] sm:$0xff]  ;;  %v1139_v55 = vld [vmem:[#allocation7 + $0x58] sm:$0xff] }
 0x237   :  { %v2123_v56 = vpack.c.bf16 %v1139_v55, %v1137_v54  ;;  %v1172_v55 = vld [vmem:[#allocation7 + $0x160] sm:$0xff] }
 0x239   :  { %1974 = vmatpush1.bf16.msra.mxu1 %v1973_v62  ;;  %2102 = vmatpush1.bf16.msra.mxu0 %v2101_v63  ;;  %v2127_v62 = vpack.c.bf16 %v1143_v60, %v1141_v59  ;;  %v1140_v63 = vld [vmem:[#allocation7 + $0x60] sm:$0xff] }
 0x23a   :  { %1976 = vmatprep.subr.bf16.mxu1 %v1975_v4  ;;  %2104 = vmatprep.subr.bf16.mxu0 %v2103_v5  ;;  %v1147_v4 = vld [vmem:[#allocation7 + $0x98] sm:$0xff]  ;;  %v2129_v5 = vpack.c.bf16 %v1142_v0, %v1140_v63  ;;  %v1176_v60 = vld [vmem:[#allocation7 + $0x180] sm:$0xff] }
 0x23b   :  { %v2131_v6 = vpack.c.bf16 %v1147_v4, %v1145_v1  ;;  %v1183_v63 = vld [vmem:[#allocation7 + $0x1b8] sm:$0xff]  ;;  %v1180_v4 = vld [vmem:[#allocation7 + $0x1a0] sm:$0xff] }
 0x23d   :  { %1978 = vmatpush1.bf16.msra.mxu1 %v1977_v13  ;;  %2106 = vmatpush1.bf16.msra.mxu0 %v2105_v14  ;;  %v2135_v13 = vpack.c.bf16 %v1151_v11, %v1149_v10  ;;  %v1148_v14 = vld [vmem:[#allocation7 + $0xa0] sm:$0xff] }
 0x23e   :  { %1980 = vmatprep.subr.bf16.mxu1 %v1979_v21  ;;  %2108 = vmatprep.subr.bf16.mxu0 %v2107_v22  ;;  %v1155_v21 = vld [vmem:[#allocation7 + $0xd8] sm:$0xff]  ;;  %v2137_v22 = vpack.c.bf16 %v1150_v17, %v1148_v14  ;;  %v1184_v11 = vld [vmem:[#allocation7 + $0x1c0] sm:$0xff]  ;;  %v1189_v14 = vld [vmem:[#allocation7 + $0x1e8] sm:$0xff] }
 0x23f   :  { %v2139_v23 = vpack.c.bf16 %v1155_v21, %v1153_v19  ;;  %v1191_v17 = vld [vmem:[#allocation7 + $0x1f8] sm:$0xff]  ;;  %v1188_v21 = vld [vmem:[#allocation7 + $0x1e0] sm:$0xff] }
 0x240   :  { %v2175_v19 = vpack.c.bf16 %v1191_v17, %v1189_v14  ;;  %v1449_v14 = vld [vmem:[#allocation8 + $0x118] sm:$0xff] }
 0x241   :  { %1982 = vmatpush1.bf16.msra.mxu1 %v1981_v29  ;;  %2110 = vmatpush1.bf16.msra.mxu0 %v2109_v30  ;;  %v2143_v29 = vpack.c.bf16 %v1159_v27, %v1157_v26  ;;  %v1156_v30 = vld [vmem:[#allocation7 + $0xe0] sm:$0xff]  ;;  %v2179_v26 = vpack.c.bf16 %v1195_v25, %v1193_v24  ;;  %v1415_v27 = vld [vmem:[#allocation8 + $0x8] sm:$0xff]  ;;  %v1453_v24 = vld [vmem:[#allocation8 + $0x138] sm:$0xff] }
 0x242   :  { %1984 = vmatprep.subr.bf16.mxu1 %v1983_v33  ;;  %2112 = vmatprep.subr.bf16.mxu0 %v2111_v34  ;;  %v1163_v33 = vld [vmem:[#allocation7 + $0x118] sm:$0xff]  ;;  %v2145_v34 = vpack.c.bf16 %v1158_v31, %v1156_v30  ;;  %v1416_v31 = vld [vmem:[#allocation8 + $0x10] sm:$0xff] }
 0x243   :  { %v2147_v35 = vpack.c.bf16 %v1163_v33, %v1161_v32  ;;  %v1419_v32 = vld [vmem:[#allocation8 + $0x28] sm:$0xff]  ;;  %v1421_v33 = vld [vmem:[#allocation8 + $0x38] sm:$0xff] }
 0x245   :  { %1986 = vmatpush1.bf16.msra.mxu1 %v1985_v40  ;;  %2114 = vmatpush1.bf16.msra.mxu0 %v2113_v41  ;;  %v2149_v40 = vpack.c.bf16 %v1162_v37, %v1160_v36  ;;  %v2151_v41 = vpack.c.bf16 %v1167_v39, %v1165_v38  ;;  %v1418_v36 = vld [vmem:[#allocation8 + $0x20] sm:$0xff]  ;;  %v1420_v37 = vld [vmem:[#allocation8 + $0x30] sm:$0xff]  ;;  %v1423_v38 = vld [vmem:[#allocation8 + $0x48] sm:$0xff] }
 0x246   :  { %2116 = vmatprep.subr.bf16.mxu1 %v2115_v43  ;;  %v1166_v43 = vld [vmem:[#allocation7 + $0x130] sm:$0xff]  ;;  %v1425_v39 = vld [vmem:[#allocation8 + $0x58] sm:$0xff] }
 0x247   :  { %v2153_v45 = vpack.c.bf16 %v1166_v43, %v1164_v42  ;;  %v1422_v42 = vld [vmem:[#allocation8 + $0x40] sm:$0xff]  ;;  %v1424_v43 = vld [vmem:[#allocation8 + $0x50] sm:$0xff] }
 0x248   :  { %976 = vmatmul.mubr.f32.vlgmr.msra.gmra.mrb[2].mxu1 %v560_v48  ;;  %1118 = vmatmul.mubr.f32.vlgmr.msra.gmra.mrb[4].mxu0 %v560_v48  ;;  %v1170_v48 = vld [vmem:[#allocation7 + $0x150] sm:$0xff] }
 0x249   :  { %2118 = vmatpush1.bf16.msra.mxu1 %v2117_v47  ;;  %v1168_v47 = vld [vmem:[#allocation7 + $0x140] sm:$0xff] }
 0x24a   :  { %2120 = vmatprep.subr.bf16.mxu1 %v2119_v50  ;;  %v1173_v50 = vld [vmem:[#allocation7 + $0x168] sm:$0xff]  ;;  %v2157_v52 = vpack.c.bf16 %v1170_v48, %v1168_v47  ;;  %v1426_v47 = vld [vmem:[#allocation8 + $0x60] sm:$0xff]  ;;  %v1428_v48 = vld [vmem:[#allocation8 + $0x70] sm:$0xff] }
 0x24b   :  { %v2159_v54 = vpack.c.bf16 %v1175_v51, %v1173_v50  ;;  %v1431_v50 = vld [vmem:[#allocation8 + $0x88] sm:$0xff]  ;;  %v1433_v51 = vld [vmem:[#allocation8 + $0x98] sm:$0xff] }
 0x24d   :  { %2122 = vmatpush1.bf16.msra.mxu1 %v2121_v8  ;;  %v1174_v8 = vld [vmem:[#allocation7 + $0x170] sm:$0xff] }
 0x24e   :  { %2124 = vmatprep.subr.bf16.mxu1 %v2123_v56  ;;  %v1177_v56 = vld [vmem:[#allocation7 + $0x188] sm:$0xff]  ;;  %v2161_v58 = vpack.c.bf16 %v1174_v8, %v1172_v55  ;;  %v1430_v55 = vld [vmem:[#allocation8 + $0x80] sm:$0xff]  ;;  %v1432_v8 = vld [vmem:[#allocation8 + $0x90] sm:$0xff] }
 0x24f   :  { %v2163_v59 = vpack.c.bf16 %v1179_v57, %v1177_v56  ;;  %v1435_v56 = vld [vmem:[#allocation8 + $0xa8] sm:$0xff]  ;;  %v1437_v57 = vld [vmem:[#allocation8 + $0xb8] sm:$0xff] }
 0x251   :  { %2126 = vmatpush1.bf16.msra.mxu1 %v2125_v61  ;;  %v1178_v61 = vld [vmem:[#allocation7 + $0x190] sm:$0xff] }
 0x252   :  { %2128 = vmatprep.subr.bf16.mxu1 %v2127_v62  ;;  %v1181_v62 = vld [vmem:[#allocation7 + $0x1a8] sm:$0xff]  ;;  %v2165_v0 = vpack.c.bf16 %v1178_v61, %v1176_v60  ;;  %v1434_v60 = vld [vmem:[#allocation8 + $0xa0] sm:$0xff]  ;;  %v1436_v61 = vld [vmem:[#allocation8 + $0xb0] sm:$0xff] }
 0x253   :  { %v2167_v1 = vpack.c.bf16 %v1183_v63, %v1181_v62  ;;  %v1439_v62 = vld [vmem:[#allocation8 + $0xc8] sm:$0xff]  ;;  %v1441_v63 = vld [vmem:[#allocation8 + $0xd8] sm:$0xff] }
 0x255   :  { %2130 = vmatpush1.bf16.msra.mxu1 %v2129_v5  ;;  %v1182_v5 = vld [vmem:[#allocation7 + $0x1b0] sm:$0xff] }
 0x256   :  { %2132 = vmatprep.subr.bf16.mxu1 %v2131_v6  ;;  %v1185_v6 = vld [vmem:[#allocation7 + $0x1c8] sm:$0xff]  ;;  %v2169_v9 = vpack.c.bf16 %v1182_v5, %v1180_v4  ;;  %v1438_v4 = vld [vmem:[#allocation8 + $0xc0] sm:$0xff]  ;;  %v1440_v5 = vld [vmem:[#allocation8 + $0xd0] sm:$0xff] }
 0x257   :  { %v2171_v10 = vpack.c.bf16 %v1187_v7, %v1185_v6  ;;  %v1443_v6 = vld [vmem:[#allocation8 + $0xe8] sm:$0xff]  ;;  %v1445_v7 = vld [vmem:[#allocation8 + $0xf8] sm:$0xff] }
 0x259   :  { %2134 = vmatpush1.bf16.msra.mxu1 %v2133_v12  ;;  %v1186_v12 = vld [vmem:[#allocation7 + $0x1d0] sm:$0xff] }
 0x25a   :  { %2136 = vmatprep.subr.bf16.mxu1 %v2135_v13  ;;  %v2173_v13 = vpack.c.bf16 %v1186_v12, %v1184_v11  ;;  %v1442_v11 = vld [vmem:[#allocation8 + $0xe0] sm:$0xff]  ;;  %v1444_v12 = vld [vmem:[#allocation8 + $0xf0] sm:$0xff] }
 0x25b   :  { %v2273_v17 = vpack.c.bf16 %v1444_v12, %v1442_v11  ;;  %v1196_v12 = vld [vmem:[#allocation7 + $0x220] sm:$0xff] }
 0x25d   :  { %2138 = vmatpush1.bf16.msra.mxu1 %v2137_v22  ;;  %v1190_v22 = vld [vmem:[#allocation7 + $0x1f0] sm:$0xff] }
 0x25e   :  { %2140 = vmatprep.subr.bf16.mxu1 %v2139_v23  ;;  %v2177_v23 = vpack.c.bf16 %v1190_v22, %v1188_v21  ;;  %v1446_v21 = vld [vmem:[#allocation8 + $0x100] sm:$0xff]  ;;  %v1448_v22 = vld [vmem:[#allocation8 + $0x110] sm:$0xff] }
 0x25f   :  { %v2277_v25 = vpack.c.bf16 %v1448_v22, %v1446_v21  ;;  %v1200_v22 = vld [vmem:[#allocation7 + $0x240] sm:$0xff] }
 0x261   :  { %2142 = vmatpush1.bf16.msra.mxu1 %v2141_v28  ;;  %v1417_v28 = vld [vmem:[#allocation8 + $0x18] sm:$0xff] }
 0x262   :  { %2144 = vmatprep.subr.bf16.mxu1 %v2143_v29  ;;  %v1414_v29 = vld [vmem:[#allocation8] sm:$0xff]  ;;  %v2243_v30 = vpack.c.bf16 %v1417_v28, %v1415_v27  ;;  %v1452_v28 = vld [vmem:[#allocation8 + $0x130] sm:$0xff] }
 0x263   :  { %v1450_v27 = vld [vmem:[#allocation8 + $0x120] sm:$0xff] }
 0x264   :  { %2244 = vmatprep.subr.bf16.mxu0 %v2243_v30  ;;  %v1457_v30 = vld [vmem:[#allocation8 + $0x158] sm:$0xff] }
 0x265   :  { %2146 = vmatpush1.bf16.msra.mxu1 %v2145_v34  ;;  %v2245_v34 = vpack.c.bf16 %v1416_v31, %v1414_v29  ;;  %v1455_v29 = vld [vmem:[#allocation8 + $0x148] sm:$0xff]  ;;  %v2281_v31 = vpack.c.bf16 %v1452_v28, %v1450_v27  ;;  %v1204_v28 = vld [vmem:[#allocation7 + $0x260] sm:$0xff] }
 0x266   :  { %2148 = vmatprep.subr.bf16.mxu1 %v2147_v35  ;;  %v2247_v35 = vpack.c.bf16 %v1421_v33, %v1419_v32  ;;  %v2283_v32 = vpack.c.bf16 %v1457_v30, %v1455_v29  ;;  %v1454_v33 = vld [vmem:[#allocation8 + $0x140] sm:$0xff]  ;;  %v1206_v29 = vld [vmem:[#allocation7 + $0x270] sm:$0xff]  ;;  %v1209_v30 = vld [vmem:[#allocation7 + $0x288] sm:$0xff] }
 0x267   :  { %2246 = vmatpush1.bf16.msra.mxu0 %v2245_v34  ;;  %v1456_v34 = vld [vmem:[#allocation8 + $0x150] sm:$0xff] }
 0x268   :  { %2248 = vmatprep.subr.bf16.mxu0 %v2247_v35  ;;  %v1459_v35 = vld [vmem:[#allocation8 + $0x168] sm:$0xff] }
 0x269   :  { %2150 = vmatpush1.bf16.msra.mxu1 %v2149_v40  ;;  %v2249_v40 = vpack.c.bf16 %v1420_v37, %v1418_v36  ;;  %v1461_v36 = vld [vmem:[#allocation8 + $0x178] sm:$0xff]  ;;  %v2285_v37 = vpack.c.bf16 %v1456_v34, %v1454_v33  ;;  %v1208_v34 = vld [vmem:[#allocation7 + $0x280] sm:$0xff] }
 0x26a   :  { %2152 = vmatprep.subr.bf16.mxu1 %v2151_v41  ;;  %v2251_v41 = vpack.c.bf16 %v1425_v39, %v1423_v38  ;;  %v2287_v38 = vpack.c.bf16 %v1461_v36, %v1459_v35  ;;  %v1458_v39 = vld [vmem:[#allocation8 + $0x160] sm:$0xff]  ;;  %v1210_v35 = vld [vmem:[#allocation7 + $0x290] sm:$0xff]  ;;  %v1213_v36 = vld [vmem:[#allocation7 + $0x2a8] sm:$0xff] }
 0x26b   :  { %2250 = vmatpush1.bf16.msra.mxu0 %v2249_v40  ;;  %v1460_v40 = vld [vmem:[#allocation8 + $0x170] sm:$0xff] }
 0x26c   :  { %2252 = vmatprep.subr.bf16.mxu0 %v2251_v41  ;;  %v1463_v41 = vld [vmem:[#allocation8 + $0x188] sm:$0xff] }
 0x26d   :  { %2154 = vmatpush1.bf16.msra.mxu1 %v2153_v45  ;;  %v2253_v45 = vpack.c.bf16 %v1424_v43, %v1422_v42  ;;  %v1465_v42 = vld [vmem:[#allocation8 + $0x198] sm:$0xff]  ;;  %v2289_v43 = vpack.c.bf16 %v1460_v40, %v1458_v39  ;;  %v1212_v40 = vld [vmem:[#allocation7 + $0x2a0] sm:$0xff] }
 0x26e   :  { %2156 = vmatprep.subr.bf16.mxu1 %v2155_v46  ;;  %v2255_v46 = vpack.c.bf16 %v1429_v2, %v1427_v44  ;;  %v2291_v44 = vpack.c.bf16 %v1465_v42, %v1463_v41  ;;  %v1462_v2 = vld [vmem:[#allocation8 + $0x180] sm:$0xff]  ;;  %v1214_v41 = vld [vmem:[#allocation7 + $0x2b0] sm:$0xff]  ;;  %v1217_v42 = vld [vmem:[#allocation7 + $0x2c8] sm:$0xff] }
 0x26f   :  { %2254 = vmatpush1.bf16.msra.mxu0 %v2253_v45  ;;  %v1464_v45 = vld [vmem:[#allocation8 + $0x190] sm:$0xff] }
 0x270   :  { %2256 = vmatprep.subr.bf16.mxu0 %v2255_v46  ;;  %v1467_v46 = vld [vmem:[#allocation8 + $0x1a8] sm:$0xff] }
 0x271   :  { %2158 = vmatpush1.bf16.msra.mxu1 %v2157_v52  ;;  %v2257_v52 = vpack.c.bf16 %v1428_v48, %v1426_v47  ;;  %v1469_v47 = vld [vmem:[#allocation8 + $0x1b8] sm:$0xff]  ;;  %v2293_v48 = vpack.c.bf16 %v1464_v45, %v1462_v2  ;;  %v1216_v45 = vld [vmem:[#allocation7 + $0x2c0] sm:$0xff] }
 0x272   :  { %2160 = vmatprep.subr.bf16.mxu1 %v2159_v54  ;;  %v2259_v54 = vpack.c.bf16 %v1433_v51, %v1431_v50  ;;  %v2295_v50 = vpack.c.bf16 %v1469_v47, %v1467_v46  ;;  %v1466_v51 = vld [vmem:[#allocation8 + $0x1a0] sm:$0xff]  ;;  %v1218_v46 = vld [vmem:[#allocation7 + $0x2d0] sm:$0xff]  ;;  %v1221_v47 = vld [vmem:[#allocation7 + $0x2e8] sm:$0xff] }
 0x273   :  { %2258 = vmatpush1.bf16.msra.mxu0 %v2257_v52  ;;  %v1468_v52 = vld [vmem:[#allocation8 + $0x1b0] sm:$0xff] }
 0x274   :  { %2260 = vmatprep.subr.bf16.mxu0 %v2259_v54  ;;  %v2698_v54 = vld [vmem:[%s2853_s8] sm:$0xf] }
 0x275   :  { %2162 = vmatpush1.bf16.msra.mxu1 %v2161_v58  ;;  %v2261_v58 = vpack.c.bf16 %v1432_v8, %v1430_v55  ;;  %v2297_v55 = vpack.c.bf16 %v1468_v52, %v1466_v51  ;;  %v823_v8 = vrot.slane %v2698_v54, %v2644_v16  ;;  %v1220_v52 = vld [vmem:[#allocation7 + $0x2e0] sm:$0xff] }
 0x276   :  { %2164 = vmatprep.subr.bf16.mxu1 %v2163_v59  ;;  %v2263_v59 = vpack.c.bf16 %v1437_v57, %v1435_v56  ;;  %v827_v56 = vrot.slane %v2698_v54, %v2650_v18  ;;  %v835_v57 = vrot.slane %v2698_v54, %v410_v3 }
 0x277   :  { %2262 = vmatpush1.bf16.msra.mxu0 %v2261_v58 }
 0x278   :  { %2264 = vmatprep.subr.bf16.mxu0 %v2263_v59 }
 0x279   :  { %2166 = vmatpush1.bf16.msra.mxu1 %v2165_v0  ;;  %v2265_v0 = vpack.c.bf16 %v1436_v61, %v1434_v60 }
 0x27a   :  { %2168 = vmatprep.subr.bf16.mxu1 %v2167_v1  ;;  %v2267_v1 = vpack.c.bf16 %v1441_v63, %v1439_v62  ;;  %v1192_v63 = vld [vmem:[#allocation7 + $0x200] sm:$0xff] }
 0x27b   :  { %2266 = vmatpush1.bf16.msra.mxu0 %v2265_v0  ;;  %v1194_v0 = vld [vmem:[#allocation7 + $0x210] sm:$0xff] }
 0x27c   :  { %2268 = vmatprep.subr.bf16.mxu0 %v2267_v1 }
 0x27d   :  { %2170 = vmatpush1.bf16.msra.mxu1 %v2169_v9  ;;  %v2269_v9 = vpack.c.bf16 %v1440_v5, %v1438_v4  ;;  %v1197_v5 = vld [vmem:[#allocation7 + $0x228] sm:$0xff] }
 0x27e   :  { %2172 = vmatprep.subr.bf16.mxu1 %v2171_v10  ;;  %v2271_v10 = vpack.c.bf16 %v1445_v7, %v1443_v6  ;;  %v1199_v6 = vld [vmem:[#allocation7 + $0x238] sm:$0xff] }
 0x27f   :  { %2270 = vmatpush1.bf16.msra.mxu0 %v2269_v9  ;;  %v2181_v9 = vpack.c.bf16 %v1194_v0, %v1192_v63  ;;  %v2183_v11 = vpack.c.bf16 %v1199_v6, %v1197_v5  ;;  %v1231_v63 = vld [vmem:[#allocation7 + $0x338] sm:$0xff]  ;;  %v1230_v5 = vld [vmem:[#allocation7 + $0x330] sm:$0xff]  ;;  %v1233_v6 = vld [vmem:[#allocation7 + $0x348] sm:$0xff] }
 0x280   :  { %2272 = vmatprep.subr.bf16.mxu0 %v2271_v10 }
 0x281   :  { %2174 = vmatpush1.bf16.msra.mxu1 %v2173_v13  ;;  %v1447_v13 = vld [vmem:[#allocation8 + $0x108] sm:$0xff] }
 0x282   :  { %2176 = vmatprep.subr.bf16.mxu1 %v2175_v19  ;;  %v2275_v19 = vpack.c.bf16 %v1449_v14, %v1447_v13  ;;  %v1198_v13 = vld [vmem:[#allocation7 + $0x230] sm:$0xff]  ;;  %v1201_v14 = vld [vmem:[#allocation7 + $0x248] sm:$0xff] }
 0x283   :  { %2274 = vmatpush1.bf16.msra.mxu0 %v2273_v17  ;;  %v1203_v17 = vld [vmem:[#allocation7 + $0x258] sm:$0xff] }
 0x284   :  { %2276 = vmatprep.subr.bf16.mxu0 %v2275_v19  ;;  %v2185_v19 = vpack.c.bf16 %v1198_v13, %v1196_v12  ;;  %v2187_v21 = vpack.c.bf16 %v1203_v17, %v1201_v14  ;;  %v1234_v12 = vld [vmem:[#allocation7 + $0x350] sm:$0xff]  ;;  %v1237_v13 = vld [vmem:[#allocation7 + $0x368] sm:$0xff] }
 0x285   :  { %2178 = vmatpush1.bf16.msra.mxu1 %v2177_v23  ;;  %v1451_v23 = vld [vmem:[#allocation8 + $0x128] sm:$0xff] }
 0x286   :  { %2180 = vmatprep.subr.bf16.mxu1 %v2179_v26  ;;  %v2279_v26 = vpack.c.bf16 %v1453_v24, %v1451_v23  ;;  %v1202_v23 = vld [vmem:[#allocation7 + $0x250] sm:$0xff]  ;;  %v1205_v24 = vld [vmem:[#allocation7 + $0x268] sm:$0xff] }
 0x287   :  { %2278 = vmatpush1.bf16.msra.mxu0 %v2277_v25  ;;  %v1207_v25 = vld [vmem:[#allocation7 + $0x278] sm:$0xff] }
 0x288   :  { %2280 = vmatprep.subr.bf16.mxu0 %v2279_v26  ;;  %v2189_v26 = vpack.c.bf16 %v1202_v23, %v1200_v22  ;;  %v2191_v27 = vpack.c.bf16 %v1207_v25, %v1205_v24  ;;  %v1241_v22 = vld [vmem:[#allocation7 + $0x388] sm:$0xff]  ;;  %v1243_v23 = vld [vmem:[#allocation7 + $0x398] sm:$0xff] }
 0x289   :  { %v2227_v25 = vpack.c.bf16 %v1243_v23, %v1241_v22  ;;  %v1585_v22 = vld [vmem:[%s2858_s13 + $0xa0] sm:$0xff]  ;;  %v1586_v23 = vld [vmem:[%s2858_s13 + $0xa8] sm:$0xff] }
 0x28b   :  { %2282 = vmatpush1.bf16.msra.mxu0 %v2281_v31  ;;  %v1211_v31 = vld [vmem:[#allocation7 + $0x298] sm:$0xff] }
 0x28c   :  { %2284 = vmatprep.subr.bf16.mxu0 %v2283_v32  ;;  %v2193_v32 = vpack.c.bf16 %v1206_v29, %v1204_v28  ;;  %v2195_v33 = vpack.c.bf16 %v1211_v31, %v1209_v30  ;;  %v1245_v28 = vld [vmem:[#allocation7 + $0x3a8] sm:$0xff]  ;;  %v1247_v29 = vld [vmem:[#allocation7 + $0x3b8] sm:$0xff] }
 0x28d   :  { %v2231_v31 = vpack.c.bf16 %v1247_v29, %v1245_v28  ;;  %v1587_v28 = vld [vmem:[%s2858_s13 + $0xb0] sm:$0xff]  ;;  %v1588_v29 = vld [vmem:[%s2858_s13 + $0xb8] sm:$0xff] }
 0x28f   :  { %2286 = vmatpush1.bf16.msra.mxu0 %v2285_v37  ;;  %v1215_v37 = vld [vmem:[#allocation7 + $0x2b8] sm:$0xff] }
 0x290   :  { %2288 = vmatprep.subr.bf16.mxu0 %v2287_v38  ;;  %v2197_v38 = vpack.c.bf16 %v1210_v35, %v1208_v34  ;;  %v2199_v39 = vpack.c.bf16 %v1215_v37, %v1213_v36  ;;  %v1249_v34 = vld [vmem:[#allocation7 + $0x3c8] sm:$0xff]  ;;  %v1251_v35 = vld [vmem:[#allocation7 + $0x3d8] sm:$0xff] }
 0x291   :  { %v2235_v37 = vpack.c.bf16 %v1251_v35, %v1249_v34  ;;  %v1589_v34 = vld [vmem:[%s2858_s13 + $0xc0] sm:$0xff]  ;;  %v1590_v35 = vld [vmem:[%s2858_s13 + $0xc8] sm:$0xff] }
 0x293   :  { %2290 = vmatpush1.bf16.msra.mxu0 %v2289_v43  ;;  %v1219_v43 = vld [vmem:[#allocation7 + $0x2d8] sm:$0xff] }
 0x294   :  { %2292 = vmatprep.subr.bf16.mxu0 %v2291_v44  ;;  %v2201_v44 = vpack.c.bf16 %v1214_v41, %v1212_v40  ;;  %v2203_v2 = vpack.c.bf16 %v1219_v43, %v1217_v42  ;;  %v1253_v40 = vld [vmem:[#allocation7 + $0x3e8] sm:$0xff]  ;;  %v1255_v41 = vld [vmem:[#allocation7 + $0x3f8] sm:$0xff]  ;;  %v831_v43 = vrot.slane %v2698_v54, %v406_v20 }
 0x295   :  { %v1475_v20 = vld [vmem:[#allocation8 + $0x1e8] sm:$0xff]  ;;  %v1477_v54 = vld [vmem:[#allocation8 + $0x1f8] sm:$0xff] }
 0x297   :  { %2294 = vmatpush1.bf16.msra.mxu0 %v2293_v48  ;;  %v1223_v48 = vld [vmem:[#allocation7 + $0x2f8] sm:$0xff] }
 0x298   :  { %2296 = vmatprep.subr.bf16.mxu0 %v2295_v50  ;;  %v2205_v50 = vpack.c.bf16 %v1218_v46, %v1216_v45  ;;  %v2207_v51 = vpack.c.bf16 %v1223_v48, %v1221_v47  ;;  %v1254_v45 = vld [vmem:[#allocation7 + $0x3f0] sm:$0xff] }
 0x29b   :  { %2298 = vmatpush1.bf16.msra.mxu0 %v2297_v55  ;;  %v1222_v55 = vld [vmem:[#allocation7 + $0x2f0] sm:$0xff] }
 0x31b   :  { %v977_v58 = vpop.f32.mrb[2].mxu1  ;;  %v2707_v59 = vpop.f32.mrb[4].mxu0 }
 0x31c   :  { %v2339_v60 = vadd.f32 %v977_v58, %v823_v8  ;;  %v979_v61 = vpop.f32.mrb[3].mxu1  ;;  %v1121_v62 = vpop.f32.mrb[5].mxu0  ;;  %v1225_v8 = vld [vmem:[#allocation7 + $0x308] sm:$0xff]  ;;  %v2341_v47 = vadd.f32 %v2707_v59, %v831_v43  ;;  %v1581_v59 = vld [vmem:[%s2858_s13 + $0x80] sm:$0xff] }
 0x31d   :  { %v2340_v1 = vadd.f32 %v979_v61, %v827_v56  ;;  %v2342_v4 = vadd.f32 %v1121_v62, %v835_v57  ;;  %v1227_v56 = vld [vmem:[#allocation7 + $0x318] sm:$0xff]  ;;  %v2209_v57 = vpack.c.bf16 %v1222_v55, %v1220_v52  ;;  %v1226_v61 = vld [vmem:[#allocation7 + $0x310] sm:$0xff]  ;;  %v1229_v62 = vld [vmem:[#allocation7 + $0x328] sm:$0xff] }
 0x31e   :  { %v1124_v10 = vmax.f32 %v2339_v60, 0.0  ;;  %v2211_v58 = vpack.c.bf16 %v1227_v56, %v1225_v8  ;;  %v1224_v60 = vld [vmem:[#allocation7 + $0x300] sm:$0xff]  ;;  %v1126_v48 = vmax.f32 %v2341_v47, 0.0  ;;  %v1472_v8 = vld [vmem:[#allocation8 + $0x1d0] sm:$0xff]  ;;  %v2303_v56 = vpack.c.bf16 %v1477_v54, %v1475_v20  ;;  %v1594_v47 = vld [vmem:[%s2858_s13 + $0xe8] sm:$0xff] }
 0x31f   :  { %v1125_v7 = vmax.f32 %v2340_v1, 0.0  ;;  %v1127_v3 = vmax.f32 %v2342_v4, 0.0  ;;  %v2213_v0 = vpack.c.bf16 %v1226_v61, %v1224_v60  ;;  %v2215_v1 = vpack.c.bf16 %v1231_v63, %v1229_v62  ;;  %v1228_v4 = vld [vmem:[#allocation7 + $0x320] sm:$0xff]  ;;  %v1582_v61 = vld [vmem:[%s2858_s13 + $0x88] sm:$0xff]  ;;  %v1579_v20 = vld [vmem:[%s2858_s13 + $0x70] sm:$0xff] }
 0x320   :  { %v1470_v55 = vld [vmem:[#allocation8 + $0x1c0] sm:$0xff]  ;;  %v2307_v62 = vpack.c.bf16 %v1582_v61, %v1581_v59  ;;  %v1580_v54 = vld [vmem:[%s2858_s13 + $0x78] sm:$0xff] }
 0x321   :  { %1332 = vmatprep.mubr.f32.mxu1 %v1125_v7  ;;  %v1235_v7 = vld [vmem:[#allocation7 + $0x358] sm:$0xff]  ;;  %v2301_v15 = vpack.c.bf16 %v1472_v8, %v1470_v55  ;;  %v1256_v63 = vld [vmem:[%s2855_s10] sm:$0x3]  ;;  %v1595_v55 = vld [vmem:[%s2858_s13 + $0xf0] sm:$0xff] }
 0x322   :  { %1333 = vmatmul.mubr.f32.vlgmr.msra.gmra.mrb[4].mxu1 %v1124_v10  ;;  %v2219_v10 = vpack.c.bf16 %v1235_v7, %v1233_v6  ;;  %v1596_v8 = vld [vmem:[%s2858_s13 + $0xf8] sm:$0xff] }
 0x323   :  { %2182 = vmatpush1.bf16.msra.mxu1 %v2181_v9  ;;  %1403 = vmatprep.mubr.f32.mxu1 %v1127_v3  ;;  %v2217_v9 = vpack.c.bf16 %v1230_v5, %v1228_v4  ;;  %v1239_v3 = vld [vmem:[#allocation7 + $0x378] sm:$0xff] }
 0x324   :  { %2184 = vmatprep.subr.bf16.mxu1 %v2183_v11  ;;  %v1232_v11 = vld [vmem:[#allocation7 + $0x340] sm:$0xff]  ;;  %v2223_v17 = vpack.c.bf16 %v1239_v3, %v1237_v13  ;;  %v1583_v13 = vld [vmem:[%s2858_s13 + $0x90] sm:$0xff] }
 0x325   :  { %v2221_v14 = vpack.c.bf16 %v1234_v12, %v1232_v11  ;;  %v1566_v11 = vld [vmem:[%s2858_s13 + $0x8] sm:$0xff] }
 0x327   :  { %2186 = vmatpush1.bf16.msra.mxu1 %v2185_v19  ;;  %v1236_v19 = vld [vmem:[#allocation7 + $0x360] sm:$0xff] }
 0x328   :  { %2188 = vmatprep.subr.bf16.mxu1 %v2187_v21  ;;  %v1238_v21 = vld [vmem:[#allocation7 + $0x370] sm:$0xff] }
 0x329   :  { %v2225_v24 = vpack.c.bf16 %v1238_v21, %v1236_v19  ;;  %v1567_v21 = vld [vmem:[%s2858_s13 + $0x10] sm:$0xff] }
 0x32b   :  { %2190 = vmatpush1.bf16.msra.mxu1 %v2189_v26  ;;  %v1240_v26 = vld [vmem:[#allocation7 + $0x380] sm:$0xff] }
 0x32c   :  { %2192 = vmatprep.subr.bf16.mxu1 %v2191_v27  ;;  %v1242_v27 = vld [vmem:[#allocation7 + $0x390] sm:$0xff] }
 0x32d   :  { %v2229_v30 = vpack.c.bf16 %v1242_v27, %v1240_v26  ;;  %v1569_v26 = vld [vmem:[%s2858_s13 + $0x20] sm:$0xff]  ;;  %v1570_v27 = vld [vmem:[%s2858_s13 + $0x28] sm:$0xff] }
 0x32f   :  { %2194 = vmatpush1.bf16.msra.mxu1 %v2193_v32  ;;  %v1244_v32 = vld [vmem:[#allocation7 + $0x3a0] sm:$0xff] }
 0x330   :  { %2196 = vmatprep.subr.bf16.mxu1 %v2195_v33  ;;  %v1246_v33 = vld [vmem:[#allocation7 + $0x3b0] sm:$0xff] }
 0x331   :  { %v2233_v36 = vpack.c.bf16 %v1246_v33, %v1244_v32  ;;  %v1571_v32 = vld [vmem:[%s2858_s13 + $0x30] sm:$0xff]  ;;  %v1572_v33 = vld [vmem:[%s2858_s13 + $0x38] sm:$0xff] }
 0x333   :  { %2198 = vmatpush1.bf16.msra.mxu1 %v2197_v38  ;;  %v1248_v38 = vld [vmem:[#allocation7 + $0x3c0] sm:$0xff] }
 0x334   :  { %2200 = vmatprep.subr.bf16.mxu1 %v2199_v39  ;;  %v1250_v39 = vld [vmem:[#allocation7 + $0x3d0] sm:$0xff] }
 0x335   :  { %v2237_v42 = vpack.c.bf16 %v1250_v39, %v1248_v38  ;;  %v1573_v38 = vld [vmem:[%s2858_s13 + $0x40] sm:$0xff]  ;;  %v1574_v39 = vld [vmem:[%s2858_s13 + $0x48] sm:$0xff] }
 0x337   :  { %2202 = vmatpush1.bf16.msra.mxu1 %v2201_v44  ;;  %v2239_v44 = vpack.c.bf16 %v1255_v41, %v1253_v40  ;;  %v1591_v40 = vld [vmem:[%s2858_s13 + $0xd0] sm:$0xff]  ;;  %v1592_v41 = vld [vmem:[%s2858_s13 + $0xd8] sm:$0xff] }
 0x338   :  { %2204 = vmatprep.subr.bf16.mxu1 %v2203_v2  ;;  %v1252_v2 = vld [vmem:[#allocation7 + $0x3e0] sm:$0xff]  ;;  %v2327_v43 = vpack.c.bf16 %v1592_v41, %v1591_v40 }
 0x339   :  { %v2241_v46 = vpack.c.bf16 %v1254_v45, %v1252_v2  ;;  %v1576_v2 = vld [vmem:[%s2858_s13 + $0x58] sm:$0xff] }
 0x33b   :  { %2206 = vmatpush1.bf16.msra.mxu1 %v2205_v50  ;;  %v1471_v50 = vld [vmem:[#allocation8 + $0x1c8] sm:$0xff] }
 0x33c   :  { %2208 = vmatprep.subr.bf16.mxu1 %v2207_v51  ;;  %v1473_v51 = vld [vmem:[#allocation8 + $0x1d8] sm:$0xff] }
 0x33d   :  { %v2299_v52 = vpack.c.bf16 %v1473_v51, %v1471_v50  ;;  %v1577_v50 = vld [vmem:[%s2858_s13 + $0x60] sm:$0xff]  ;;  %v1578_v51 = vld [vmem:[%s2858_s13 + $0x68] sm:$0xff] }
 0x33f   :  { %2210 = vmatpush1.bf16.msra.mxu1 %v2209_v57  ;;  %2300 = vmatprep.subr.bf16.mxu0 %v2299_v52  ;;  %v1474_v57 = vld [vmem:[#allocation8 + $0x1e0] sm:$0xff]  ;;  %v2333_v52 = vpack.c.bf16 %v1578_v51, %v1577_v50 }
 0x340   :  { %2212 = vmatprep.subr.bf16.mxu1 %v2211_v58  ;;  %2302 = vmatpush1.bf16.msra.mxu0 %v2301_v15  ;;  %v1476_v58 = vld [vmem:[#allocation8 + $0x1f0] sm:$0xff]  ;;  %v2335_v15 = vpack.c.bf16 %v1596_v8, %v1595_v55 }
 0x341   :  { %v2305_v60 = vpack.c.bf16 %v1476_v58, %v1474_v57  ;;  %2304 = vmatprep.subr.bf16.mxu0 %v2303_v56  ;;  %v2337_v56 = vpack.c.bf16 %v1580_v54, %v1579_v20  ;;  %v1478_v57 = vld [vmem:[%s2857_s12] sm:$0x3]  ;;  %s2492_s12 = smov [#allocation10]  }
 0x342   :  { %v1483_v58 = vrot.slane %v1478_v57, %v2644_v16  ;;  %s1681_s0 = sshll.u32 %s2492_s12, 4  ;;  %s1682_s0 = int_to_ptr.vmem [resolvable:$true] %s1681_s0 }
 0x343   :  { %2214 = vmatpush1.bf16.msra.mxu1 %v2213_v0  ;;  %v1261_v0 = vrot.slane %v1256_v63, %v2644_v16  ;;  %s2452_s1 = scalar_lea.vmem %s1682_s0, 128  ;;  %p2457_p5 = scmp.lt.s32.totalorder %s1682_s0, %s1682_s0 }
 0x344   :  { %2216 = vmatprep.subr.bf16.mxu1 %v2215_v1  ;;  %2306 = vmatpush1.bf16.msra.mxu0 %v2305_v60  ;;  %v1265_v1 = vrot.slane %v1256_v63, %v2650_v18  ;;  %v1487_v60 = vrot.slane %v1478_v57, %v2650_v18  ;;  %p2453_p4 = scmp.ne.s32.totalorder %s1682_s0, %s2452_s1  ;;  %p2458_p6 = scmp.lt.s32.totalorder %s2452_s1, %s2452_s1 }
 0x345   :  { %2308 = vmatprep.subr.bf16.mxu0 %v2307_v62 }
 0x346   :  { %p2459_p7 = por %p2458_p6, %p2457_p5 }
 0x347   :  { %2218 = vmatpush1.bf16.msra.mxu1 %v2217_v9 }
 0x348   :  { %2220 = vmatprep.subr.bf16.mxu1 %v2219_v10  ;;  %v1565_v10 = vld [vmem:[%s2858_s13] sm:$0xff]  ;;  %p2460_p8 = pnand %p2459_p7, %p2453_p4 }
 0x34b   :  { %2222 = vmatpush1.bf16.msra.mxu1 %v2221_v14  ;;  %v2309_v14 = vpack.c.bf16 %v1566_v11, %v1565_v10 }
 0x34c   :  { %2224 = vmatprep.subr.bf16.mxu1 %v2223_v17 }
 0x34f   :  { %2226 = vmatpush1.bf16.msra.mxu1 %v2225_v24 }
 0x350   :  { %2228 = vmatprep.subr.bf16.mxu1 %v2227_v25  ;;  %v2315_v25 = vpack.c.bf16 %v1586_v23, %v1585_v22 }
 0x353   :  { %2230 = vmatpush1.bf16.msra.mxu1 %v2229_v30  ;;  %v2317_v30 = vpack.c.bf16 %v1570_v27, %v1569_v26 }
 0x354   :  { %2232 = vmatprep.subr.bf16.mxu1 %v2231_v31  ;;  %v2319_v31 = vpack.c.bf16 %v1588_v29, %v1587_v28 }
 0x357   :  { %2234 = vmatpush1.bf16.msra.mxu1 %v2233_v36  ;;  %v2321_v36 = vpack.c.bf16 %v1572_v33, %v1571_v32 }
 0x358   :  { %2236 = vmatprep.subr.bf16.mxu1 %v2235_v37  ;;  %v2323_v37 = vpack.c.bf16 %v1590_v35, %v1589_v34 }
 0x35b   :  { %2238 = vmatpush1.bf16.msra.mxu1 %v2237_v42  ;;  %v2325_v42 = vpack.c.bf16 %v1574_v39, %v1573_v38 }
 0x35c   :  { %2240 = vmatprep.subr.bf16.mxu1 %v2239_v44  ;;  %v1575_v44 = vld [vmem:[%s2858_s13 + $0x50] sm:$0xff] }
 0x35d   :  { %v2329_v45 = vpack.c.bf16 %v1576_v2, %v1575_v44 }
 0x35f   :  { %2242 = vmatpush1.bf16.msra.mxu1 %v2241_v46  ;;  %v1593_v46 = vld [vmem:[%s2858_s13 + $0xe0] sm:$0xff] }
 0x362   :  { %1404 = vmatmul.mubr.f32.vlgmr.msra.gmra.mrb[4].mxu1 %v1126_v48  ;;  %v2331_v48 = vpack.c.bf16 %v1594_v47, %v1593_v46 }
 0x435   :  { %v1405_v4 = vpop.f32.mrb[4].mxu1 }
 0x436   :  { %v2343_v5 = vadd.f32 %v1405_v4, %v1261_v0  ;;  %v1407_v6 = vpop.f32.mrb[5].mxu1 }
 0x437   :  { %v2344_v7 = vadd.f32 %v1407_v6, %v1265_v1 }
 0x438   :  { %v2725_v9 = vadd.f32 %v2343_v5, %v2669_v49  ;;  %v1584_v49 = vld [vmem:[%s2858_s13 + $0x98] sm:$0xff] }
 0x439   :  { %v2734_v12 = vadd.f32 %v2344_v7, %v2671_v53  ;;  %v2311_v19 = vpack.c.bf16 %v1584_v49, %v1583_v13  ;;  %v1568_v53 = vld [vmem:[%s2858_s13 + $0x18] sm:$0xff]  ;;  %v1695_v7 = vld [vmem:[%s2859_s14] ss:$0 sm:$0xff] }
 0x43a   :  { %v1412_v17 = vmax.f32 %v2725_v9, 0.0  ;;  %v2313_v24 = vpack.c.bf16 %v1568_v53, %v1567_v21 }
 0x43b   :  { %v1413_v3 = vmax.f32 %v2734_v12, 0.0 }
 0x43d   :  { %1554 = vmatprep.mubr.f32.mxu0 %v1413_v3 }
 0x43e   :  { %1555 = vmatmul.mubr.f32.vlgmr.msra.gmra.mrb[6].mxu0 %v1412_v17 }
 0x43f   :  { %2310 = vmatpush3.bf16.msra.mxu0 %v2309_v14 }
 0x440   :  { %2312 = vmatprep.subr.bf16.mxu0 %v2311_v19 }
 0x443   :  { %2314 = vmatpush3.bf16.msra.mxu0 %v2313_v24 }
 0x444   :  { %2316 = vmatprep.subr.bf16.mxu0 %v2315_v25 }
 0x447   :  { %2318 = vmatpush3.bf16.msra.mxu0 %v2317_v30 }
 0x448   :  { %2320 = vmatprep.subr.bf16.mxu0 %v2319_v31 }
 0x44b   :  { %2322 = vmatpush3.bf16.msra.mxu0 %v2321_v36 }
 0x44c   :  { %2324 = vmatprep.subr.bf16.mxu0 %v2323_v37 }
 0x44f   :  { %2326 = vmatpush3.bf16.msra.mxu0 %v2325_v42 }
 0x450   :  { %2328 = vmatprep.subr.bf16.mxu0 %v2327_v43 }
 0x453   :  { %2330 = vmatpush3.bf16.msra.mxu0 %v2329_v45 }
 0x454   :  { %2332 = vmatprep.subr.bf16.mxu0 %v2331_v48 }
 0x457   :  { %2334 = vmatpush3.bf16.msra.mxu0 %v2333_v52 }
 0x458   :  { %2336 = vmatprep.subr.bf16.mxu0 %v2335_v15 }
 0x45b   :  { %2338 = vmatpush3.bf16.msra.mxu0 %v2337_v56 }
 0x511   :  { %v1556_v59 = vpop.f32.mrb[6].mxu0 }
 0x512   :  { %v1557_v61 = vadd.f32 %v1556_v59, %v1483_v58  ;;  %v1558_v62 = vpop.f32.mrb[7].mxu0 }
 0x513   :  { %v1559_v63 = vadd.f32 %v1558_v62, %v1487_v60 }
 0x514   :  { %v1561_v0 = vadd.f32 %v1557_v61, %v2725_v9 }
 0x515   :  { %v1562_v1 = vadd.f32 %v1559_v63, %v2734_v12 }
 0x516   :  { %v1563_v5 = vmax.f32 %v1561_v0, 0.0 }
 0x517   :  { %v1564_v4 = vmax.f32 %v1562_v1, 0.0 }
 0x519   :  { %1668 = vmatprep.mubr.f32.mxu0 %v1564_v4 }
 0x51a   :  { %1669 = vmatmul.mubr.f32.vlgmr.msra.gmra.mrb[8].mxu0 %v1563_v5 }
 0x5ed   :  { %v1728_v6 = vpop.f32.mrb[8].mxu0 }
 0x5ee   :  { %v1729_v16 = vpop.f32.mrb[9].mxu0 }
 0x5ef   :  { %v1730_v18 = vadd.f32 %v1729_v16, %v1728_v6 }
 0x5f1   :  { %v1671_v10 = vadd.f32 %v1730_v18, %v1695_v7 }
 0x5f3   :  { %1674 = vst.msk [vmem:[#allocation10] sm:$0xff] %vm131_vm0, %v1671_v10 }
 0x5f4   :  { %2463 = shalt.err (!%p2460_p8)
}
 0x5f5   :  { %s2464_s19 = scalar_lea.hbm %s2860_s15, 128 }
 0x5f6   :  { %p2465_p9 = scmp.ne.s32.totalorder %s2860_s15, %s2464_s19  ;;  %p2468_p10 = scmp.lt.u32.totalorder %s2464_s19, %s2860_s15 }
 0x5f8   :  { %p2470_p11 = pnand %p2468_p10, %p2465_p9 }
 0x5fa   :  { %2473 = shalt.err (!%p2470_p11)
}
 0x5fb   :  { %1684 = dma.vmem_to_hbm [thread:$0]  %s1682_s0, 128, %s2860_s15, [#allocation4]  }
 0x5fc   :  { %2480 = dma.done.wait [#allocation4], 128  }
 0x5fd   :  { %2481 = vsyncadd [#allocation4], 4294967168 }
 0x5fe   :  { %1688 = vsyncpa [#allocation3], 1 }
 0x5ff   :  { %1689 = vsyncpa [#allocation6], 1 }
 0x600   :  { %1690 = vsyncpa [#allocation9], 1 }
 0x601   :  { %1691 = vsyncpa [#allocation4], 1 }

</bundles_post_ra>
